<compile_context>
chip_gen: v6e
topology: v6e:2x2x1
jax: 0.10.0
libtpu: 0.0.40
codegen_flags: <defaults>
</compile_context>

<pallas_src>
import math

import jax
import jax.numpy as jnp
from jax import lax
from jax.experimental import pallas as pl
from jax.experimental.pallas import tpu as pltpu


# dot_general dimension numbers for A @ B.T (contract last dims of both).
_NT_DIMS = (((1,), (1,)), ((), ()))

# Flipped to False by the __main__ fallback if the installed jaxlib rejects
# single-buffered (pl.Buffered(1)) top-level BlockSpecs.
_SINGLE_BUFFER_WEIGHTS = True


def _layernorm(x, gamma, beta, eps=1e-5):
    # x: (rows, D) f32, gamma/beta: (1, D) f32
    mu = jnp.mean(x, axis=-1, keepdims=True)
    xc = x - mu
    var = jnp.mean(xc * xc, axis=-1, keepdims=True)
    return xc * lax.rsqrt(var + eps) * gamma + beta


def _gelu_exact(x):
    # nn.GELU() default in PyTorch is the exact erf-based GELU.
    # TODO(synk): tanh-approximate GELU (EUP slot) if bit-parity not required.
    return 0.5 * x * (1.0 + lax.erf(x * (1.0 / math.sqrt(2.0))))


def _const_spec(shape):
    """Weight/bias block: same tile every grid step -> single VMEM buffer."""
    kwargs = {}
    if _SINGLE_BUFFER_WEIGHTS and hasattr(pl, "Buffered"):
        kwargs["pipeline_mode"] = pl.Buffered(1)
    return pl.BlockSpec(shape, lambda b, i: (0,) * len(shape), **kwargs)


# ---------------------------------------------------------------------------
# Pass 1: LN1 + fused QKV projection (computed once per row of the sequence).
# ---------------------------------------------------------------------------
def _qkv_kernel(x_ref, ln1g_ref, ln1b_ref, wqkv_ref, q_ref, kv_ref):
    f32, bf16 = jnp.float32, jnp.bfloat16
    D = x_ref.shape[-1]

    xn = _layernorm(x_ref[0], ln1g_ref[...], ln1b_ref[...]).astype(bf16)
    # One lane-dense (rows, D) @ (D, 3D) MXU matmul; the 1/sqrt(dh) attention
    # scale is folded into the Q columns of Wqkv at init (zero runtime cost).
    y = jnp.dot(xn, wqkv_ref[...], preferred_element_type=f32)
    q_ref[0] = y[:, :D].astype(bf16)        # scaled Q
    kv_ref[0] = y[:, D:].astype(bf16)       # K | V


# ---------------------------------------------------------------------------
# Pass 2: attention + output projection + residual + FFN per (batch, q-tile).
# ---------------------------------------------------------------------------
def _attn_ffn_kernel(x_ref, q_ref, kv_ref,
                     wo_ref, bo_ref, ln2g_ref, ln2b_ref,
                     w1_ref, b1_ref, w2_ref, b2_ref,
                     o_ref):
    f32, bf16 = jnp.float32, jnp.bfloat16

    x = x_ref[0]                      # (TQ, D) f32 residual rows
    q = q_ref[0]                      # (TQ, D) bf16, LN'd + projected + scaled
    kv = kv_ref[0]                    # (N, 2D) bf16, full sequence K | V
    D = x.shape[-1]
    num_heads, dh, _ = wo_ref.shape

    # TODO(synk): lax.fori_loop over heads once num_heads >= 8.
    proj = jnp.zeros_like(x)
    for h in range(num_heads):
        qh = q[:, h * dh:(h + 1) * dh]                         # (TQ, dh) bf16
        kh = kv[:, h * dh:(h + 1) * dh]                        # (N,  dh) bf16
        vh = kv[:, D + h * dh:D + (h + 1) * dh]                # (N,  dh) bf16

        s = lax.dot_general(qh, kh, _NT_DIMS,
                            preferred_element_type=f32)        # (TQ, N) f32
        s = s - jnp.max(s, axis=-1, keepdims=True)
        # TODO(synk): bf16 exp on v6e/v7x (EUP bf16 path) would ~2x exp tput.
        p = jnp.exp(s)
        l = jnp.sum(p, axis=-1, keepdims=True)                 # f32 row sums
        oh = jnp.dot(p.astype(bf16), vh, preferred_element_type=f32)  # (TQ, dh)
        # Normalize AFTER PV: (TQ, dh) multiply instead of (TQ, N).
        oh = oh * pl.reciprocal(l, approx=True)
        # Folded output projection: sum_h (o_h @ Wo_h) == concat_h(o_h) @ Wo.
        proj = proj + jnp.dot(oh.astype(bf16), wo_ref[h],
                              preferred_element_type=f32)      # (TQ, D)

    x1 = x + proj + bo_ref[...]                 # residual 1 (+ out-proj bias)

    # ---- PreNorm + FeedForward ----
    x1n = _layernorm(x1, ln2g_ref[...], ln2b_ref[...]).astype(bf16)
    h1 = jnp.dot(x1n, w1_ref[...], preferred_element_type=f32) + b1_ref[...]
    h1 = _gelu_exact(h1)
    h2 = jnp.dot(h1.astype(bf16), w2_ref[...], preferred_element_type=f32) + b2_ref[...]
    o_ref[0] = (x1 + h2).astype(o_ref.dtype)    # residual 2


# ---------------------------------------------------------------------------
# Wrappers
# ---------------------------------------------------------------------------
def _tpu_vmem_capacity_bytes():
    try:
        info = pltpu.get_tpu_info()
        for name in ("vmem_capacity_bytes", "vmem_size_bytes"):
            cap = getattr(info, name, None)
            if cap:
                return int(cap)
    except Exception:
        pass
    return 64 * 1024 * 1024          # conservative (v7x-sized) fallback


def _pick_q_tile(n, vmem_cap_bytes):
    # 512-row tiles on 128 MiB-VMEM parts (v5e/v6e), 256 on v7x (64 MiB).
    big = 512 if vmem_cap_bytes >= 96 * 1024 * 1024 else 256
    for t in (big, 256, 128):
        if n % t == 0:
            return t
    return n


def transformer_layer(x, lp, *, tq, vmem_limit):
    """One PreNorm-Attention + PreNorm-FFN block. x: (B, N, D) float32."""
    B, N, D = x.shape
    H, dh, _ = lp["wo"].shape
    M = lp["w1"].shape[1]
    nq = N // tq

    cparams = pltpu.CompilerParams(
        dimension_semantics=("parallel", "parallel"),
        vmem_limit_bytes=vmem_limit,
    )

    # ---- Pass 1: LN1 + fused QKV projection ----
    q, kv = pl.pallas_call(
        _qkv_kernel,
        out_shape=(jax.ShapeDtypeStruct((B, N, D), jnp.bfloat16),
                   jax.ShapeDtypeStruct((B, N, 2 * D), jnp.bfloat16)),
        grid_spec=pltpu.PrefetchScalarGridSpec(
            num_scalar_prefetch=0,
            grid=(B, nq),
            in_specs=[
                pl.BlockSpec((1, tq, D), lambda b, ri: (b, ri, 0)),   # x rows
                _const_spec((1, D)), _const_spec((1, D)),             # ln1 g/b
                _const_spec((D, 3 * D)),                              # Wqkv bf16
            ],
            out_specs=[
                pl.BlockSpec((1, tq, D), lambda b, ri: (b, ri, 0)),       # Q
                pl.BlockSpec((1, tq, 2 * D), lambda b, ri: (b, ri, 0)),   # K|V
            ],
        ),
        compiler_params=cparams,
    )(x, lp["ln1_g"], lp["ln1_b"], lp["wqkv"])

    # ---- Pass 2: attention + out-proj + residual + FFN ----
    return pl.pallas_call(
        _attn_ffn_kernel,
        out_shape=jax.ShapeDtypeStruct((B, N, D), jnp.float32),
        grid_spec=pltpu.PrefetchScalarGridSpec(
            num_scalar_prefetch=0,
            grid=(B, nq),                                             # batch x q-tiles
            in_specs=[
                pl.BlockSpec((1, tq, D), lambda b, qi: (b, qi, 0)),   # x (residual rows)
                pl.BlockSpec((1, tq, D), lambda b, qi: (b, qi, 0)),   # Q rows (scaled)
                pl.BlockSpec((1, N, 2 * D), lambda b, qi: (b, 0, 0)), # K|V full seq (bf16)
                _const_spec((H, dh, D)),                              # Wo (head-major)
                _const_spec((1, D)),                                  # bo
                _const_spec((1, D)), _const_spec((1, D)),             # ln2 g/b
                _const_spec((D, M)), _const_spec((1, M)),             # W1, b1
                _const_spec((M, D)), _const_spec((1, D)),             # W2, b2
            ],
            out_specs=pl.BlockSpec((1, tq, D), lambda b, qi: (b, qi, 0)),
        ),
        compiler_params=cparams,
    )(x, q, kv, lp["wo"], lp["bo"], lp["ln2_g"], lp["ln2_b"],
      lp["w1"], lp["b1"], lp["w2"], lp["b2"])


def transformer_forward(x, params):
    _, N, _ = x.shape
    cap = _tpu_vmem_capacity_bytes()
    vmem_limit = min(int(0.85 * cap), 100 * 1024 * 1024)
    tq = _pick_q_tile(N, cap)
    for lp in params:
        x = transformer_layer(x, lp, tq=tq, vmem_limit=vmem_limit)
    return x


# ---------------------------------------------------------------------------
# Parameters & reference
# ---------------------------------------------------------------------------
def init_params(key, *, num_layers, hidden_dim, mlp_dim, num_heads):
    """Deterministic synthetic parameters matching the nn.Module shapes.

    PyTorch Linear stores (out, in) and computes x @ W.T; here weights are
    stored pre-transposed as (in, out).  Q/K/V are fused into a single
    (D, 3D) bf16 slab with the 1/sqrt(dh) attention scale folded into the Q
    columns; Wo is stored head-major (H, dh, D) bf16 for the folded per-head
    output projection.  Biases / LayerNorm params stay f32.
    """
    assert hidden_dim % num_heads == 0
    dh = hidden_dim // num_heads
    scale = dh ** (-0.5)
    std = 0.02
    params = []
    for l in range(num_layers):
        k = jax.random.fold_in(key, l)
        k1, k2, k3, k4, k5, k6, k7, k8, k9 = jax.random.split(k, 9)

        def w(kk, shape):
            return (std * jax.random.normal(kk, shape)).astype(jnp.float32)

        wq = w(k1, (hidden_dim, hidden_dim)) * scale     # fold 1/sqrt(dh) into Wq
        wk = w(k2, (hidden_dim, hidden_dim))
        wv = w(k3, (hidden_dim, hidden_dim))
        wqkv = jnp.concatenate([wq, wk, wv], axis=1)     # (D, 3D): y = x @ Wqkv
        wo = w(k4, (hidden_dim, hidden_dim))             # (in, out)

        params.append(dict(
            ln1_g=jnp.ones((1, hidden_dim), jnp.float32),
            ln1_b=jnp.zeros((1, hidden_dim), jnp.float32),
            wqkv=wqkv.astype(jnp.bfloat16),
            # wo[h] = Wo[h*dh:(h+1)*dh, :]
            wo=wo.reshape(num_heads, dh, hidden_dim).astype(jnp.bfloat16),
            bo=w(k5, (1, hidden_dim)),
            ln2_g=jnp.ones((1, hidden_dim), jnp.float32),
            ln2_b=jnp.zeros((1, hidden_dim), jnp.float32),
            w1=w(k6, (hidden_dim, mlp_dim)).astype(jnp.bfloat16),
            b1=w(k7, (1, mlp_dim)),
            w2=w(k8, (mlp_dim, hidden_dim)).astype(jnp.bfloat16),
            b2=w(k9, (1, hidden_dim)),
        ))
    return params


def reference_forward(x, params):
    """Pure-JAX f32 reference of the same forward pass (eval mode)."""
    f32 = jnp.float32

    def ln(y, g, b, eps=1e-5):
        mu = jnp.mean(y, axis=-1, keepdims=True)
        var = jnp.mean((y - mu) ** 2, axis=-1, keepdims=True)
        return (y - mu) / jnp.sqrt(var + eps) * g + b

    for lp in params:
        B, N, D = x.shape
        H, dh, _ = lp["wo"].shape
        xn = ln(x, lp["ln1_g"], lp["ln1_b"])
        qkv = xn @ lp["wqkv"].astype(f32)               # scale already folded into Q
        q, k, v = qkv[..., :D], qkv[..., D:2 * D], qkv[..., 2 * D:]

        def heads(t):
            return t.reshape(B, N, H, dh).transpose(0, 2, 1, 3)

        q, k, v = heads(q), heads(k), heads(v)
        s = jnp.einsum("bhne,bhme->bhnm", q, k)
        a = jax.nn.softmax(s, axis=-1)
        o = jnp.einsum("bhnm,bhme->bhne", a, v)
        o = o.transpose(0, 2, 1, 3).reshape(B, N, D)
        wo_full = lp["wo"].astype(f32).reshape(D, D)
        x = x + o @ wo_full + lp["bo"]
        xn2 = ln(x, lp["ln2_g"], lp["ln2_b"])
        h1 = jax.nn.gelu(xn2 @ lp["w1"].astype(f32) + lp["b1"], approximate=False)
        x = x + h1 @ lp["w2"].astype(f32) + lp["b2"]
    return x


if __name__ == "__main__":
    # Small config implied by the module: hidden_dim divisible by num_heads,
    # inner_dim == hidden_dim.
    B, N = 2, 8
    HIDDEN, HEADS, MLP, LAYERS = 32, 4, 64, 2

    key = jax.random.PRNGKey(0)
    kx, kp = jax.random.split(key)
    x = jax.random.normal(kx, (B, N, HIDDEN), dtype=jnp.float32)
    params = init_params(kp, num_layers=LAYERS, hidden_dim=HIDDEN,
                         mlp_dim=MLP, num_heads=HEADS)

    try:
        out = jax.block_until_ready(jax.jit(transformer_forward)(x, params))
    except Exception:
        # Fallback: some jaxlib versions reject single-buffered weight specs
        # (pl.Buffered(1)) on the top-level pallas_call; results are identical,
        # only VMEM residency differs.
        _SINGLE_BUFFER_WEIGHTS = False
        out = jax.block_until_ready(jax.jit(transformer_forward)(x, params))

    assert out.shape == (B, N, HIDDEN)
    assert bool(jnp.all(jnp.isfinite(out)))

    # Numerical sanity check against the pure-JAX reference (bf16 matmuls and
    # the approximate softmax reciprocal introduce ~1e-3-scale differences).
    ref = reference_forward(x, params)
    err = float(jnp.max(jnp.abs(out - ref)))
    assert err < 5e-2, f"max abs err {err}"

    print("KERNEL_OK")
</pallas_src>

<mosaic_0001>
module attributes {stable_mosaic.version = 11 : i64} {
  func.func @_qkv_kernel(%arg0: i32, %arg1: i32, %arg2: memref<1x8x32xf32, #tpu.memory_space<vmem>>, %arg3: memref<1x32xf32, #tpu.memory_space<vmem>>, %arg4: memref<1x32xf32, #tpu.memory_space<vmem>>, %arg5: memref<32x96xbf16, #tpu.memory_space<vmem>>, %arg6: memref<1x8x32xbf16, #tpu.memory_space<vmem>>, %arg7: memref<1x8x64xbf16, #tpu.memory_space<vmem>>) attributes {dimension_semantics = [#tpu.dimension_semantics<parallel>, #tpu.dimension_semantics<parallel>], iteration_bounds = array<i64: 2, 1>, scalar_prefetch = 0 : i64, scratch_operands = 0 : i64, tpu.core_type = #tpu.core_type<tc>, window_params = [{transform_indices = @transform_0, window_bounds = array<i64: 1, 8, 32>}, {pipeline_mode = #tpu.pipeline_mode<synchronous>, transform_indices = @transform_1, window_bounds = array<i64: 1, 32>}, {pipeline_mode = #tpu.pipeline_mode<synchronous>, transform_indices = @transform_2, window_bounds = array<i64: 1, 32>}, {pipeline_mode = #tpu.pipeline_mode<synchronous>, transform_indices = @transform_3, window_bounds = array<i64: 32, 96>}, {transform_indices = @transform_4, window_bounds = array<i64: 1, 8, 32>}, {transform_indices = @transform_5, window_bounds = array<i64: 1, 8, 64>}]} {
    %c0 = arith.constant 0 : index
    %c0_0 = arith.constant 0 : index
    %c0_1 = arith.constant 0 : index
    %0 = vector.load %arg2[%c0, %c0_0, %c0_1] : memref<1x8x32xf32, #tpu.memory_space<vmem>>, vector<1x8x32xf32>
    %1 = vector.shape_cast %0 : vector<1x8x32xf32> to vector<8x32xf32>
    %c0_2 = arith.constant 0 : index
    %c0_3 = arith.constant 0 : index
    %2 = vector.load %arg3[%c0_2, %c0_3] : memref<1x32xf32, #tpu.memory_space<vmem>>, vector<1x32xf32>
    %c0_4 = arith.constant 0 : index
    %c0_5 = arith.constant 0 : index
    %3 = vector.load %arg4[%c0_4, %c0_5] : memref<1x32xf32, #tpu.memory_space<vmem>>, vector<1x32xf32>
    %cst = arith.constant dense<0.000000e+00> : vector<8xf32>
    %4 = vector.multi_reduction <add>, %1, %cst [1] : vector<8x32xf32> to vector<8xf32>
    %5 = vector.shape_cast %4 : vector<8xf32> to vector<8x1xf32>
    %cst_6 = arith.constant 3.200000e+01 : f32
    %6 = vector.broadcast %cst_6 : f32 to vector<8x1xf32>
    %7 = arith.divf %5, %6 : vector<8x1xf32>
    %8 = vector.broadcast %7 : vector<8x1xf32> to vector<8x32xf32>
    %9 = arith.subf %1, %8 : vector<8x32xf32>
    %10 = arith.mulf %9, %9 : vector<8x32xf32>
    %cst_7 = arith.constant dense<0.000000e+00> : vector<8xf32>
    %11 = vector.multi_reduction <add>, %10, %cst_7 [1] : vector<8x32xf32> to vector<8xf32>
    %12 = vector.shape_cast %11 : vector<8xf32> to vector<8x1xf32>
    %cst_8 = arith.constant 3.200000e+01 : f32
    %13 = vector.broadcast %cst_8 : f32 to vector<8x1xf32>
    %14 = arith.divf %12, %13 : vector<8x1xf32>
    %cst_9 = arith.constant 9.99999974E-6 : f32
    %15 = vector.broadcast %cst_9 : f32 to vector<8x1xf32>
    %16 = arith.addf %14, %15 : vector<8x1xf32>
    %17 = math.rsqrt %16 : vector<8x1xf32>
    %18 = vector.broadcast %17 : vector<8x1xf32> to vector<8x32xf32>
    %19 = arith.mulf %9, %18 : vector<8x32xf32>
    %20 = vector.broadcast %2 : vector<1x32xf32> to vector<8x32xf32>
    %21 = arith.mulf %19, %20 : vector<8x32xf32>
    %22 = vector.broadcast %3 : vector<1x32xf32> to vector<8x32xf32>
    %23 = arith.addf %21, %22 : vector<8x32xf32>
    %24 = arith.truncf %23 : vector<8x32xf32> to vector<8x32xbf16>
    %c0_10 = arith.constant 0 : index
    %c0_11 = arith.constant 0 : index
    %25 = vector.load %arg5[%c0_10, %c0_11] : memref<32x96xbf16, #tpu.memory_space<vmem>>, vector<32x96xbf16>
    %cst_12 = arith.constant dense<0.000000e+00> : vector<8x96xf32>
    %26 = tpu.matmul %24, %25, %cst_12 {dimension_numbers = #tpu.dot_dimension_numbers<[1], [0], [0], [1], [0, 0, 1, 1], [], []>} : vector<8x32xbf16>, vector<32x96xbf16>, vector<8x96xf32> -> vector<8x96xf32>
    %27 = vector.extract_strided_slice %26 {offsets = [0, 0], sizes = [8, 32], strides = [1, 1]} : vector<8x96xf32> to vector<8x32xf32>
    %28 = arith.truncf %27 : vector<8x32xf32> to vector<8x32xbf16>
    %c0_13 = arith.constant 0 : index
    %c0_14 = arith.constant 0 : index
    %c0_15 = arith.constant 0 : index
    %29 = vector.load %arg6[%c0_13, %c0_14, %c0_15] : memref<1x8x32xbf16, #tpu.memory_space<vmem>>, vector<1x8x32xbf16>
    %30 = vector.shape_cast %29 : vector<1x8x32xbf16> to vector<8x32xbf16>
    %31 = vector.shape_cast %28 : vector<8x32xbf16> to vector<1x8x32xbf16>
    tpu.vector_store %arg6[%c0_13, %c0_14, %c0_15], %31 {strides = array<i32>} : memref<1x8x32xbf16, #tpu.memory_space<vmem>>, vector<1x8x32xbf16>,
    %32 = vector.extract_strided_slice %26 {offsets = [0, 32], sizes = [8, 64], strides = [1, 1]} : vector<8x96xf32> to vector<8x64xf32>
    %33 = arith.truncf %32 : vector<8x64xf32> to vector<8x64xbf16>
    %c0_16 = arith.constant 0 : index
    %c0_17 = arith.constant 0 : index
    %c0_18 = arith.constant 0 : index
    %34 = vector.load %arg7[%c0_16, %c0_17, %c0_18] : memref<1x8x64xbf16, #tpu.memory_space<vmem>>, vector<1x8x64xbf16>
    %35 = vector.shape_cast %34 : vector<1x8x64xbf16> to vector<8x64xbf16>
    %36 = vector.shape_cast %33 : vector<8x64xbf16> to vector<1x8x64xbf16>
    tpu.vector_store %arg7[%c0_16, %c0_17, %c0_18], %36 {strides = array<i32>} : memref<1x8x64xbf16, #tpu.memory_space<vmem>>, vector<1x8x64xbf16>,
    return
  }
  func.func @transform_0(%arg0: i32, %arg1: i32) -> (i32, i32, i32) {
    %c0_i32 = arith.constant 0 : i32
    %c0_i32_0 = arith.constant 0 : i32
    return %arg0, %arg1, %c0_i32 : i32, i32, i32
  }
  func.func @transform_1(%arg0: i32, %arg1: i32) -> (i32, i32) {
    %c0_i32 = arith.constant 0 : i32
    %c0_i32_0 = arith.constant 0 : i32
    %c0_i32_1 = arith.constant 0 : i32
    return %c0_i32, %c0_i32_0 : i32, i32
  }
  func.func @transform_2(%arg0: i32, %arg1: i32) -> (i32, i32) {
    %c0_i32 = arith.constant 0 : i32
    %c0_i32_0 = arith.constant 0 : i32
    %c0_i32_1 = arith.constant 0 : i32
    return %c0_i32, %c0_i32_0 : i32, i32
  }
  func.func @transform_3(%arg0: i32, %arg1: i32) -> (i32, i32) {
    %c0_i32 = arith.constant 0 : i32
    %c0_i32_0 = arith.constant 0 : i32
    %c0_i32_1 = arith.constant 0 : i32
    return %c0_i32, %c0_i32_0 : i32, i32
  }
  func.func @transform_4(%arg0: i32, %arg1: i32) -> (i32, i32, i32) {
    %c0_i32 = arith.constant 0 : i32
    %c0_i32_0 = arith.constant 0 : i32
    return %arg0, %arg1, %c0_i32 : i32, i32, i32
  }
  func.func @transform_5(%arg0: i32, %arg1: i32) -> (i32, i32, i32) {
    %c0_i32 = arith.constant 0 : i32
    %c0_i32_0 = arith.constant 0 : i32
    return %arg0, %arg1, %c0_i32 : i32, i32, i32
  }
}

module attributes {stable_mosaic.version = 11 : i64} {
  func.func @_qkv_kernel(%arg0: i32, %arg1: i32, %arg2: memref<1x8x32xf32, #tpu.memory_space<vmem>>, %arg3: memref<1x32xf32, #tpu.memory_space<vmem>>, %arg4: memref<1x32xf32, #tpu.memory_space<vmem>>, %arg5: memref<32x96xbf16, #tpu.memory_space<vmem>>, %arg6: memref<1x8x32xbf16, #tpu.memory_space<vmem>>, %arg7: memref<1x8x64xbf16, #tpu.memory_space<vmem>>) attributes {dimension_semantics = [#tpu.dimension_semantics<parallel>, #tpu.dimension_semantics<parallel>], iteration_bounds = array<i64: 2, 1>, scalar_prefetch = 0 : i64, scratch_operands = 0 : i64, tpu.core_type = #tpu.core_type<tc>, window_params = [{transform_indices = @transform_0, window_bounds = array<i64: 1, 8, 32>}, {pipeline_mode = #tpu.pipeline_mode<synchronous>, transform_indices = @transform_1, window_bounds = array<i64: 1, 32>}, {pipeline_mode = #tpu.pipeline_mode<synchronous>, transform_indices = @transform_2, window_bounds = array<i64: 1, 32>}, {pipeline_mode = #tpu.pipeline_mode<synchronous>, transform_indices = @transform_3, window_bounds = array<i64: 32, 96>}, {transform_indices = @transform_4, window_bounds = array<i64: 1, 8, 32>}, {transform_indices = @transform_5, window_bounds = array<i64: 1, 8, 64>}]} {
    %c0 = arith.constant 0 : index
    %c0_0 = arith.constant 0 : index
    %c0_1 = arith.constant 0 : index
    %0 = vector.load %arg2[%c0, %c0_0, %c0_1] : memref<1x8x32xf32, #tpu.memory_space<vmem>>, vector<1x8x32xf32>
    %1 = vector.shape_cast %0 : vector<1x8x32xf32> to vector<8x32xf32>
    %c0_2 = arith.constant 0 : index
    %c0_3 = arith.constant 0 : index
    %2 = vector.load %arg3[%c0_2, %c0_3] : memref<1x32xf32, #tpu.memory_space<vmem>>, vector<1x32xf32>
    %c0_4 = arith.constant 0 : index
    %c0_5 = arith.constant 0 : index
    %3 = vector.load %arg4[%c0_4, %c0_5] : memref<1x32xf32, #tpu.memory_space<vmem>>, vector<1x32xf32>
    %cst = arith.constant dense<0.000000e+00> : vector<8xf32>
    %4 = vector.multi_reduction <add>, %1, %cst [1] : vector<8x32xf32> to vector<8xf32>
    %5 = vector.shape_cast %4 : vector<8xf32> to vector<8x1xf32>
    %cst_6 = arith.constant 3.200000e+01 : f32
    %6 = vector.broadcast %cst_6 : f32 to vector<8x1xf32>
    %7 = arith.divf %5, %6 : vector<8x1xf32>
    %8 = vector.broadcast %7 : vector<8x1xf32> to vector<8x32xf32>
    %9 = arith.subf %1, %8 : vector<8x32xf32>
    %10 = arith.mulf %9, %9 : vector<8x32xf32>
    %cst_7 = arith.constant dense<0.000000e+00> : vector<8xf32>
    %11 = vector.multi_reduction <add>, %10, %cst_7 [1] : vector<8x32xf32> to vector<8xf32>
    %12 = vector.shape_cast %11 : vector<8xf32> to vector<8x1xf32>
    %cst_8 = arith.constant 3.200000e+01 : f32
    %13 = vector.broadcast %cst_8 : f32 to vector<8x1xf32>
    %14 = arith.divf %12, %13 : vector<8x1xf32>
    %cst_9 = arith.constant 9.99999974E-6 : f32
    %15 = vector.broadcast %cst_9 : f32 to vector<8x1xf32>
    %16 = arith.addf %14, %15 : vector<8x1xf32>
    %17 = math.rsqrt %16 : vector<8x1xf32>
    %18 = vector.broadcast %17 : vector<8x1xf32> to vector<8x32xf32>
    %19 = arith.mulf %9, %18 : vector<8x32xf32>
    %20 = vector.broadcast %2 : vector<1x32xf32> to vector<8x32xf32>
    %21 = arith.mulf %19, %20 : vector<8x32xf32>
    %22 = vector.broadcast %3 : vector<1x32xf32> to vector<8x32xf32>
    %23 = arith.addf %21, %22 : vector<8x32xf32>
    %24 = arith.truncf %23 : vector<8x32xf32> to vector<8x32xbf16>
    %c0_10 = arith.constant 0 : index
    %c0_11 = arith.constant 0 : index
    %25 = vector.load %arg5[%c0_10, %c0_11] : memref<32x96xbf16, #tpu.memory_space<vmem>>, vector<32x96xbf16>
    %cst_12 = arith.constant dense<0.000000e+00> : vector<8x96xf32>
    %26 = tpu.matmul %24, %25, %cst_12 {dimension_numbers = #tpu.dot_dimension_numbers<[1], [0], [0], [1], [0, 0, 1, 1], [], []>} : vector<8x32xbf16>, vector<32x96xbf16>, vector<8x96xf32> -> vector<8x96xf32>
    %27 = vector.extract_strided_slice %26 {offsets = [0, 0], sizes = [8, 32], strides = [1, 1]} : vector<8x96xf32> to vector<8x32xf32>
    %28 = arith.truncf %27 : vector<8x32xf32> to vector<8x32xbf16>
    %c0_13 = arith.constant 0 : index
    %c0_14 = arith.constant 0 : index
    %c0_15 = arith.constant 0 : index
    %29 = vector.load %arg6[%c0_13, %c0_14, %c0_15] : memref<1x8x32xbf16, #tpu.memory_space<vmem>>, vector<1x8x32xbf16>
    %30 = vector.shape_cast %29 : vector<1x8x32xbf16> to vector<8x32xbf16>
    %31 = vector.shape_cast %28 : vector<8x32xbf16> to vector<1x8x32xbf16>
    tpu.vector_store %arg6[%c0_13, %c0_14, %c0_15], %31 {strides = array<i32>} : memref<1x8x32xbf16, #tpu.memory_space<vmem>>, vector<1x8x32xbf16>,
    %32 = vector.extract_strided_slice %26 {offsets = [0, 32], sizes = [8, 64], strides = [1, 1]} : vector<8x96xf32> to vector<8x64xf32>
    %33 = arith.truncf %32 : vector<8x64xf32> to vector<8x64xbf16>
    %c0_16 = arith.constant 0 : index
    %c0_17 = arith.constant 0 : index
    %c0_18 = arith.constant 0 : index
    %34 = vector.load %arg7[%c0_16, %c0_17, %c0_18] : memref<1x8x64xbf16, #tpu.memory_space<vmem>>, vector<1x8x64xbf16>
    %35 = vector.shape_cast %34 : vector<1x8x64xbf16> to vector<8x64xbf16>
    %36 = vector.shape_cast %33 : vector<8x64xbf16> to vector<1x8x64xbf16>
    tpu.vector_store %arg7[%c0_16, %c0_17, %c0_18], %36 {strides = array<i32>} : memref<1x8x64xbf16, #tpu.memory_space<vmem>>, vector<1x8x64xbf16>,
    return
  }
  func.func @transform_0(%arg0: i32, %arg1: i32) -> (i32, i32, i32) {
    %c0_i32 = arith.constant 0 : i32
    %c0_i32_0 = arith.constant 0 : i32
    return %arg0, %arg1, %c0_i32 : i32, i32, i32
  }
  func.func @transform_1(%arg0: i32, %arg1: i32) -> (i32, i32) {
    %c0_i32 = arith.constant 0 : i32
    %c0_i32_0 = arith.constant 0 : i32
    %c0_i32_1 = arith.constant 0 : i32
    return %c0_i32, %c0_i32_0 : i32, i32
  }
  func.func @transform_2(%arg0: i32, %arg1: i32) -> (i32, i32) {
    %c0_i32 = arith.constant 0 : i32
    %c0_i32_0 = arith.constant 0 : i32
    %c0_i32_1 = arith.constant 0 : i32
    return %c0_i32, %c0_i32_0 : i32, i32
  }
  func.func @transform_3(%arg0: i32, %arg1: i32) -> (i32, i32) {
    %c0_i32 = arith.constant 0 : i32
    %c0_i32_0 = arith.constant 0 : i32
    %c0_i32_1 = arith.constant 0 : i32
    return %c0_i32, %c0_i32_0 : i32, i32
  }
  func.func @transform_4(%arg0: i32, %arg1: i32) -> (i32, i32, i32) {
    %c0_i32 = arith.constant 0 : i32
    %c0_i32_0 = arith.constant 0 : i32
    return %arg0, %arg1, %c0_i32 : i32, i32, i32
  }
  func.func @transform_5(%arg0: i32, %arg1: i32) -> (i32, i32, i32) {
    %c0_i32 = arith.constant 0 : i32
    %c0_i32_0 = arith.constant 0 : i32
    return %arg0, %arg1, %c0_i32 : i32, i32, i32
  }
}

module attributes {stable_mosaic.version = 11 : i64} {
  func.func @_attn_ffn_kernel(%arg0: i32, %arg1: i32, %arg2: memref<1x8x32xf32, #tpu.memory_space<vmem>>, %arg3: memref<1x8x32xbf16, #tpu.memory_space<vmem>>, %arg4: memref<1x8x64xbf16, #tpu.memory_space<vmem>>, %arg5: memref<4x8x32xbf16, #tpu.memory_space<vmem>>, %arg6: memref<1x32xf32, #tpu.memory_space<vmem>>, %arg7: memref<1x32xf32, #tpu.memory_space<vmem>>, %arg8: memref<1x32xf32, #tpu.memory_space<vmem>>, %arg9: memref<32x64xbf16, #tpu.memory_space<vmem>>, %arg10: memref<1x64xf32, #tpu.memory_space<vmem>>, %arg11: memref<64x32xbf16, #tpu.memory_space<vmem>>, %arg12: memref<1x32xf32, #tpu.memory_space<vmem>>, %arg13: memref<1x8x32xf32, #tpu.memory_space<vmem>>) attributes {dimension_semantics = [#tpu.dimension_semantics<parallel>, #tpu.dimension_semantics<parallel>], iteration_bounds = array<i64: 2, 1>, scalar_prefetch = 0 : i64, scratch_operands = 0 : i64, tpu.core_type = #tpu.core_type<tc>, window_params = [{transform_indices = @transform_0, window_bounds = array<i64: 1, 8, 32>}, {transform_indices = @transform_1, window_bounds = array<i64: 1, 8, 32>}, {transform_indices = @transform_2, window_bounds = array<i64: 1, 8, 64>}, {pipeline_mode = #tpu.pipeline_mode<synchronous>, transform_indices = @transform_3, window_bounds = array<i64: 4, 8, 32>}, {pipeline_mode = #tpu.pipeline_mode<synchronous>, transform_indices = @transform_4, window_bounds = array<i64: 1, 32>}, {pipeline_mode = #tpu.pipeline_mode<synchronous>, transform_indices = @transform_5, window_bounds = array<i64: 1, 32>}, {pipeline_mode = #tpu.pipeline_mode<synchronous>, transform_indices = @transform_6, window_bounds = array<i64: 1, 32>}, {pipeline_mode = #tpu.pipeline_mode<synchronous>, transform_indices = @transform_7, window_bounds = array<i64: 32, 64>}, {pipeline_mode = #tpu.pipeline_mode<synchronous>, transform_indices = @transform_8, window_bounds = array<i64: 1, 64>}, {pipeline_mode = #tpu.pipeline_mode<synchronous>, transform_indices = @transform_9, window_bounds = array<i64: 64, 32>}, {pipeline_mode = #tpu.pipeline_mode<synchronous>, transform_indices = @transform_10, window_bounds = array<i64: 1, 32>}, {transform_indices = @transform_11, window_bounds = array<i64: 1, 8, 32>}]} {
    %c0 = arith.constant 0 : index
    %c0_0 = arith.constant 0 : index
    %c0_1 = arith.constant 0 : index
    %0 = vector.load %arg2[%c0, %c0_0, %c0_1] : memref<1x8x32xf32, #tpu.memory_space<vmem>>, vector<1x8x32xf32>
    %1 = vector.shape_cast %0 : vector<1x8x32xf32> to vector<8x32xf32>
    %c0_2 = arith.constant 0 : index
    %c0_3 = arith.constant 0 : index
    %c0_4 = arith.constant 0 : index
    %2 = vector.load %arg3[%c0_2, %c0_3, %c0_4] : memref<1x8x32xbf16, #tpu.memory_space<vmem>>, vector<1x8x32xbf16>
    %3 = vector.shape_cast %2 : vector<1x8x32xbf16> to vector<8x32xbf16>
    %c0_5 = arith.constant 0 : index
    %c0_6 = arith.constant 0 : index
    %c0_7 = arith.constant 0 : index
    %4 = vector.load %arg4[%c0_5, %c0_6, %c0_7] : memref<1x8x64xbf16, #tpu.memory_space<vmem>>, vector<1x8x64xbf16>
    %5 = vector.shape_cast %4 : vector<1x8x64xbf16> to vector<8x64xbf16>
    %cst = arith.constant 0.000000e+00 : f32
    %6 = vector.broadcast %cst : f32 to vector<8x32xf32>
    %7 = vector.extract_strided_slice %3 {offsets = [0, 0], sizes = [8, 8], strides = [1, 1]} : vector<8x32xbf16> to vector<8x8xbf16>
    %8 = vector.extract_strided_slice %5 {offsets = [0, 0], sizes = [8, 8], strides = [1, 1]} : vector<8x64xbf16> to vector<8x8xbf16>
    %9 = vector.extract_strided_slice %5 {offsets = [0, 32], sizes = [8, 8], strides = [1, 1]} : vector<8x64xbf16> to vector<8x8xbf16>
    %cst_8 = arith.constant dense<0.000000e+00> : vector<8x8xf32>
    %10 = tpu.matmul %7, %8, %cst_8 {dimension_numbers = #tpu.dot_dimension_numbers<[1], [1], [0], [0], [0, 0, 1, 0], [], []>} : vector<8x8xbf16>, vector<8x8xbf16>, vector<8x8xf32> -> vector<8x8xf32>
    %cst_9 = arith.constant dense<0xFF800000> : vector<8xf32>
    %11 = vector.multi_reduction <maximumf>, %10, %cst_9 [1] : vector<8x8xf32> to vector<8xf32>
    %12 = vector.shape_cast %11 : vector<8xf32> to vector<8x1xf32>
    %13 = vector.broadcast %12 : vector<8x1xf32> to vector<8x8xf32>
    %14 = arith.subf %10, %13 : vector<8x8xf32>
    %15 = math.exp %14 : vector<8x8xf32>
    %cst_10 = arith.constant dense<0.000000e+00> : vector<8xf32>
    %16 = vector.multi_reduction <add>, %15, %cst_10 [1] : vector<8x8xf32> to vector<8xf32>
    %17 = vector.shape_cast %16 : vector<8xf32> to vector<8x1xf32>
    %18 = arith.truncf %15 : vector<8x8xf32> to vector<8x8xbf16>
    %cst_11 = arith.constant dense<0.000000e+00> : vector<8x8xf32>
    %19 = tpu.matmul %18, %9, %cst_11 {dimension_numbers = #tpu.dot_dimension_numbers<[1], [0], [0], [1], [0, 0, 1, 1], [], []>} : vector<8x8xbf16>, vector<8x8xbf16>, vector<8x8xf32> -> vector<8x8xf32>
    %20 = tpu.reciprocal %17 {approx = true} : vector<8x1xf32> -> vector<8x1xf32>
    %21 = vector.broadcast %20 : vector<8x1xf32> to vector<8x8xf32>
    %22 = arith.mulf %19, %21 : vector<8x8xf32>
    %23 = arith.truncf %22 : vector<8x8xf32> to vector<8x8xbf16>
    %c0_12 = arith.constant 0 : index
    %c0_13 = arith.constant 0 : index
    %c0_14 = arith.constant 0 : index
    %24 = vector.load %arg5[%c0_12, %c0_13, %c0_14] : memref<4x8x32xbf16, #tpu.memory_space<vmem>>, vector<1x8x32xbf16>
    %25 = vector.shape_cast %24 : vector<1x8x32xbf16> to vector<8x32xbf16>
    %cst_15 = arith.constant dense<0.000000e+00> : vector<8x32xf32>
    %26 = tpu.matmul %23, %25, %cst_15 {dimension_numbers = #tpu.dot_dimension_numbers<[1], [0], [0], [1], [0, 0, 1, 1], [], []>} : vector<8x8xbf16>, vector<8x32xbf16>, vector<8x32xf32> -> vector<8x32xf32>
    %27 = arith.addf %6, %26 : vector<8x32xf32>
    %28 = vector.extract_strided_slice %3 {offsets = [0, 8], sizes = [8, 8], strides = [1, 1]} : vector<8x32xbf16> to vector<8x8xbf16>
    %29 = vector.extract_strided_slice %5 {offsets = [0, 8], sizes = [8, 8], strides = [1, 1]} : vector<8x64xbf16> to vector<8x8xbf16>
    %30 = vector.extract_strided_slice %5 {offsets = [0, 40], sizes = [8, 8], strides = [1, 1]} : vector<8x64xbf16> to vector<8x8xbf16>
    %cst_16 = arith.constant dense<0.000000e+00> : vector<8x8xf32>
    %31 = tpu.matmul %28, %29, %cst_16 {dimension_numbers = #tpu.dot_dimension_numbers<[1], [1], [0], [0], [0, 0, 1, 0], [], []>} : vector<8x8xbf16>, vector<8x8xbf16>, vector<8x8xf32> -> vector<8x8xf32>
    %cst_17 = arith.constant dense<0xFF800000> : vector<8xf32>
    %32 = vector.multi_reduction <maximumf>, %31, %cst_17 [1] : vector<8x8xf32> to vector<8xf32>
    %33 = vector.shape_cast %32 : vector<8xf32> to vector<8x1xf32>
    %34 = vector.broadcast %33 : vector<8x1xf32> to vector<8x8xf32>
    %35 = arith.subf %31, %34 : vector<8x8xf32>
    %36 = math.exp %35 : vector<8x8xf32>
    %cst_18 = arith.constant dense<0.000000e+00> : vector<8xf32>
    %37 = vector.multi_reduction <add>, %36, %cst_18 [1] : vector<8x8xf32> to vector<8xf32>
    %38 = vector.shape_cast %37 : vector<8xf32> to vector<8x1xf32>
    %39 = arith.truncf %36 : vector<8x8xf32> to vector<8x8xbf16>
    %cst_19 = arith.constant dense<0.000000e+00> : vector<8x8xf32>
    %40 = tpu.matmul %39, %30, %cst_19 {dimension_numbers = #tpu.dot_dimension_numbers<[1], [0], [0], [1], [0, 0, 1, 1], [], []>} : vector<8x8xbf16>, vector<8x8xbf16>, vector<8x8xf32> -> vector<8x8xf32>
    %41 = tpu.reciprocal %38 {approx = true} : vector<8x1xf32> -> vector<8x1xf32>
    %42 = vector.broadcast %41 : vector<8x1xf32> to vector<8x8xf32>
    %43 = arith.mulf %40, %42 : vector<8x8xf32>
    %44 = arith.truncf %43 : vector<8x8xf32> to vector<8x8xbf16>
    %c1 = arith.constant 1 : index
    %c0_20 = arith.constant 0 : index
    %c0_21 = arith.constant 0 : index
    %45 = vector.load %arg5[%c1, %c0_20, %c0_21] : memref<4x8x32xbf16, #tpu.memory_space<vmem>>, vector<1x8x32xbf16>
    %46 = vector.shape_cast %45 : vector<1x8x32xbf16> to vector<8x32xbf16>
    %cst_22 = arith.constant dense<0.000000e+00> : vector<8x32xf32>
    %47 = tpu.matmul %44, %46, %cst_22 {dimension_numbers = #tpu.dot_dimension_numbers<[1], [0], [0], [1], [0, 0, 1, 1], [], []>} : vector<8x8xbf16>, vector<8x32xbf16>, vector<8x32xf32> -> vector<8x32xf32>
    %48 = arith.addf %27, %47 : vector<8x32xf32>
    %49 = vector.extract_strided_slice %3 {offsets = [0, 16], sizes = [8, 8], strides = [1, 1]} : vector<8x32xbf16> to vector<8x8xbf16>
    %50 = vector.extract_strided_slice %5 {offsets = [0, 16], sizes = [8, 8], strides = [1, 1]} : vector<8x64xbf16> to vector<8x8xbf16>
    %51 = vector.extract_strided_slice %5 {offsets = [0, 48], sizes = [8, 8], strides = [1, 1]} : vector<8x64xbf16> to vector<8x8xbf16>
    %cst_23 = arith.constant dense<0.000000e+00> : vector<8x8xf32>
    %52 = tpu.matmul %49, %50, %cst_23 {dimension_numbers = #tpu.dot_dimension_numbers<[1], [1], [0], [0], [0, 0, 1, 0], [], []>} : vector<8x8xbf16>, vector<8x8xbf16>, vector<8x8xf32> -> vector<8x8xf32>
    %cst_24 = arith.constant dense<0xFF800000> : vector<8xf32>
    %53 = vector.multi_reduction <maximumf>, %52, %cst_24 [1] : vector<8x8xf32> to vector<8xf32>
    %54 = vector.shape_cast %53 : vector<8xf32> to vector<8x1xf32>
    %55 = vector.broadcast %54 : vector<8x1xf32> to vector<8x8xf32>
    %56 = arith.subf %52, %55 : vector<8x8xf32>
    %57 = math.exp %56 : vector<8x8xf32>
    %cst_25 = arith.constant dense<0.000000e+00> : vector<8xf32>
    %58 = vector.multi_reduction <add>, %57, %cst_25 [1] : vector<8x8xf32> to vector<8xf32>
    %59 = vector.shape_cast %58 : vector<8xf32> to vector<8x1xf32>
    %60 = arith.truncf %57 : vector<8x8xf32> to vector<8x8xbf16>
    %cst_26 = arith.constant dense<0.000000e+00> : vector<8x8xf32>
    %61 = tpu.matmul %60, %51, %cst_26 {dimension_numbers = #tpu.dot_dimension_numbers<[1], [0], [0], [1], [0, 0, 1, 1], [], []>} : vector<8x8xbf16>, vector<8x8xbf16>, vector<8x8xf32> -> vector<8x8xf32>
    %62 = tpu.reciprocal %59 {approx = true} : vector<8x1xf32> -> vector<8x1xf32>
    %63 = vector.broadcast %62 : vector<8x1xf32> to vector<8x8xf32>
    %64 = arith.mulf %61, %63 : vector<8x8xf32>
    %65 = arith.truncf %64 : vector<8x8xf32> to vector<8x8xbf16>
    %c2 = arith.constant 2 : index
    %c0_27 = arith.constant 0 : index
    %c0_28 = arith.constant 0 : index
    %66 = vector.load %arg5[%c2, %c0_27, %c0_28] : memref<4x8x32xbf16, #tpu.memory_space<vmem>>, vector<1x8x32xbf16>
    %67 = vector.shape_cast %66 : vector<1x8x32xbf16> to vector<8x32xbf16>
    %cst_29 = arith.constant dense<0.000000e+00> : vector<8x32xf32>
    %68 = tpu.matmul %65, %67, %cst_29 {dimension_numbers = #tpu.dot_dimension_numbers<[1], [0], [0], [1], [0, 0, 1, 1], [], []>} : vector<8x8xbf16>, vector<8x32xbf16>, vector<8x32xf32> -> vector<8x32xf32>
    %69 = arith.addf %48, %68 : vector<8x32xf32>
    %70 = vector.extract_strided_slice %3 {offsets = [0, 24], sizes = [8, 8], strides = [1, 1]} : vector<8x32xbf16> to vector<8x8xbf16>
    %71 = vector.extract_strided_slice %5 {offsets = [0, 24], sizes = [8, 8], strides = [1, 1]} : vector<8x64xbf16> to vector<8x8xbf16>
    %72 = vector.extract_strided_slice %5 {offsets = [0, 56], sizes = [8, 8], strides = [1, 1]} : vector<8x64xbf16> to vector<8x8xbf16>
    %cst_30 = arith.constant dense<0.000000e+00> : vector<8x8xf32>
    %73 = tpu.matmul %70, %71, %cst_30 {dimension_numbers = #tpu.dot_dimension_numbers<[1], [1], [0], [0], [0, 0, 1, 0], [], []>} : vector<8x8xbf16>, vector<8x8xbf16>, vector<8x8xf32> -> vector<8x8xf32>
    %cst_31 = arith.constant dense<0xFF800000> : vector<8xf32>
    %74 = vector.multi_reduction <maximumf>, %73, %cst_31 [1] : vector<8x8xf32> to vector<8xf32>
    %75 = vector.shape_cast %74 : vector<8xf32> to vector<8x1xf32>
    %76 = vector.broadcast %75 : vector<8x1xf32> to vector<8x8xf32>
    %77 = arith.subf %73, %76 : vector<8x8xf32>
    %78 = math.exp %77 : vector<8x8xf32>
    %cst_32 = arith.constant dense<0.000000e+00> : vector<8xf32>
    %79 = vector.multi_reduction <add>, %78, %cst_32 [1] : vector<8x8xf32> to vector<8xf32>
    %80 = vector.shape_cast %79 : vector<8xf32> to vector<8x1xf32>
    %81 = arith.truncf %78 : vector<8x8xf32> to vector<8x8xbf16>
    %cst_33 = arith.constant dense<0.000000e+00> : vector<8x8xf32>
    %82 = tpu.matmul %81, %72, %cst_33 {dimension_numbers = #tpu.dot_dimension_numbers<[1], [0], [0], [1], [0, 0, 1, 1], [], []>} : vector<8x8xbf16>, vector<8x8xbf16>, vector<8x8xf32> -> vector<8x8xf32>
    %83 = tpu.reciprocal %80 {approx = true} : vector<8x1xf32> -> vector<8x1xf32>
    %84 = vector.broadcast %83 : vector<8x1xf32> to vector<8x8xf32>
    %85 = arith.mulf %82, %84 : vector<8x8xf32>
    %86 = arith.truncf %85 : vector<8x8xf32> to vector<8x8xbf16>
    %c3 = arith.constant 3 : index
    %c0_34 = arith.constant 0 : index
    %c0_35 = arith.constant 0 : index
    %87 = vector.load %arg5[%c3, %c0_34, %c0_35] : memref<4x8x32xbf16, #tpu.memory_space<vmem>>, vector<1x8x32xbf16>
    %88 = vector.shape_cast %87 : vector<1x8x32xbf16> to vector<8x32xbf16>
    %cst_36 = arith.constant dense<0.000000e+00> : vector<8x32xf32>
    %89 = tpu.matmul %86, %88, %cst_36 {dimension_numbers = #tpu.dot_dimension_numbers<[1], [0], [0], [1], [0, 0, 1, 1], [], []>} : vector<8x8xbf16>, vector<8x32xbf16>, vector<8x32xf32> -> vector<8x32xf32>
    %90 = arith.addf %69, %89 : vector<8x32xf32>
    %91 = arith.addf %1, %90 : vector<8x32xf32>
    %c0_37 = arith.constant 0 : index
    %c0_38 = arith.constant 0 : index
    %92 = vector.load %arg6[%c0_37, %c0_38] : memref<1x32xf32, #tpu.memory_space<vmem>>, vector<1x32xf32>
    %93 = vector.broadcast %92 : vector<1x32xf32> to vector<8x32xf32>
    %94 = arith.addf %91, %93 : vector<8x32xf32>
    %c0_39 = arith.constant 0 : index
    %c0_40 = arith.constant 0 : index
    %95 = vector.load %arg7[%c0_39, %c0_40] : memref<1x32xf32, #tpu.memory_space<vmem>>, vector<1x32xf32>
    %c0_41 = arith.constant 0 : index
    %c0_42 = arith.constant 0 : index
    %96 = vector.load %arg8[%c0_41, %c0_42] : memref<1x32xf32, #tpu.memory_space<vmem>>, vector<1x32xf32>
    %cst_43 = arith.constant dense<0.000000e+00> : vector<8xf32>
    %97 = vector.multi_reduction <add>, %94, %cst_43 [1] : vector<8x32xf32> to vector<8xf32>
    %98 = vector.shape_cast %97 : vector<8xf32> to vector<8x1xf32>
    %cst_44 = arith.constant 3.200000e+01 : f32
    %99 = vector.broadcast %cst_44 : f32 to vector<8x1xf32>
    %100 = arith.divf %98, %99 : vector<8x1xf32>
    %101 = vector.broadcast %100 : vector<8x1xf32> to vector<8x32xf32>
    %102 = arith.subf %94, %101 : vector<8x32xf32>
    %103 = arith.mulf %102, %102 : vector<8x32xf32>
    %cst_45 = arith.constant dense<0.000000e+00> : vector<8xf32>
    %104 = vector.multi_reduction <add>, %103, %cst_45 [1] : vector<8x32xf32> to vector<8xf32>
    %105 = vector.shape_cast %104 : vector<8xf32> to vector<8x1xf32>
    %cst_46 = arith.constant 3.200000e+01 : f32
    %106 = vector.broadcast %cst_46 : f32 to vector<8x1xf32>
    %107 = arith.divf %105, %106 : vector<8x1xf32>
    %cst_47 = arith.constant 9.99999974E-6 : f32
    %108 = vector.broadcast %cst_47 : f32 to vector<8x1xf32>
    %109 = arith.addf %107, %108 : vector<8x1xf32>
    %110 = math.rsqrt %109 : vector<8x1xf32>
    %111 = vector.broadcast %110 : vector<8x1xf32> to vector<8x32xf32>
    %112 = arith.mulf %102, %111 : vector<8x32xf32>
    %113 = vector.broadcast %95 : vector<1x32xf32> to vector<8x32xf32>
    %114 = arith.mulf %112, %113 : vector<8x32xf32>
    %115 = vector.broadcast %96 : vector<1x32xf32> to vector<8x32xf32>
    %116 = arith.addf %114, %115 : vector<8x32xf32>
    %117 = arith.truncf %116 : vector<8x32xf32> to vector<8x32xbf16>
    %c0_48 = arith.constant 0 : index
    %c0_49 = arith.constant 0 : index
    %118 = vector.load %arg9[%c0_48, %c0_49] : memref<32x64xbf16, #tpu.memory_space<vmem>>, vector<32x64xbf16>
    %cst_50 = arith.constant dense<0.000000e+00> : vector<8x64xf32>
    %119 = tpu.matmul %117, %118, %cst_50 {dimension_numbers = #tpu.dot_dimension_numbers<[1], [0], [0], [1], [0, 0, 1, 1], [], []>} : vector<8x32xbf16>, vector<32x64xbf16>, vector<8x64xf32> -> vector<8x64xf32>
    %c0_51 = arith.constant 0 : index
    %c0_52 = arith.constant 0 : index
    %120 = vector.load %arg10[%c0_51, %c0_52] : memref<1x64xf32, #tpu.memory_space<vmem>>, vector<1x64xf32>
    %121 = vector.broadcast %120 : vector<1x64xf32> to vector<8x64xf32>
    %122 = arith.addf %119, %121 : vector<8x64xf32>
    %cst_53 = arith.constant 5.000000e-01 : f32
    %123 = vector.broadcast %cst_53 : f32 to vector<8x64xf32>
    %124 = arith.mulf %123, %122 : vector<8x64xf32>
    %cst_54 = arith.constant 0.707106769 : f32
    %125 = vector.broadcast %cst_54 : f32 to vector<8x64xf32>
    %126 = arith.mulf %122, %125 : vector<8x64xf32>
    %127 = math.erf %126 : vector<8x64xf32>
    %cst_55 = arith.constant 1.000000e+00 : f32
    %128 = vector.broadcast %cst_55 : f32 to vector<8x64xf32>
    %129 = arith.addf %128, %127 : vector<8x64xf32>
    %130 = arith.mulf %124, %129 : vector<8x64xf32>
    %131 = arith.truncf %130 : vector<8x64xf32> to vector<8x64xbf16>
    %c0_56 = arith.constant 0 : index
    %c0_57 = arith.constant 0 : index
    %132 = vector.load %arg11[%c0_56, %c0_57] : memref<64x32xbf16, #tpu.memory_space<vmem>>, vector<64x32xbf16>
    %cst_58 = arith.constant dense<0.000000e+00> : vector<8x32xf32>
    %133 = tpu.matmul %131, %132, %cst_58 {dimension_numbers = #tpu.dot_dimension_numbers<[1], [0], [0], [1], [0, 0, 1, 1], [], []>} : vector<8x64xbf16>, vector<64x32xbf16>, vector<8x32xf32> -> vector<8x32xf32>
    %c0_59 = arith.constant 0 : index
    %c0_60 = arith.constant 0 : index
    %134 = vector.load %arg12[%c0_59, %c0_60] : memref<1x32xf32, #tpu.memory_space<vmem>>, vector<1x32xf32>
    %135 = vector.broadcast %134 : vector<1x32xf32> to vector<8x32xf32>
    %136 = arith.addf %133, %135 : vector<8x32xf32>
    %137 = arith.addf %94, %136 : vector<8x32xf32>
    %c0_61 = arith.constant 0 : index
    %c0_62 = arith.constant 0 : index
    %c0_63 = arith.constant 0 : index
    %138 = vector.load %arg13[%c0_61, %c0_62, %c0_63] : memref<1x8x32xf32, #tpu.memory_space<vmem>>, vector<1x8x32xf32>
    %139 = vector.shape_cast %138 : vector<1x8x32xf32> to vector<8x32xf32>
    %140 = vector.shape_cast %137 : vector<8x32xf32> to vector<1x8x32xf32>
    tpu.vector_store %arg13[%c0_61, %c0_62, %c0_63], %140 {strides = array<i32>} : memref<1x8x32xf32, #tpu.memory_space<vmem>>, vector<1x8x32xf32>,
    return
  }
  func.func @transform_0(%arg0: i32, %arg1: i32) -> (i32, i32, i32) {
    %c0_i32 = arith.constant 0 : i32
    %c0_i32_0 = arith.constant 0 : i32
    return %arg0, %arg1, %c0_i32 : i32, i32, i32
  }
  func.func @transform_1(%arg0: i32, %arg1: i32) -> (i32, i32, i32) {
    %c0_i32 = arith.constant 0 : i32
    %c0_i32_0 = arith.constant 0 : i32
    return %arg0, %arg1, %c0_i32 : i32, i32, i32
  }
  func.func @transform_2(%arg0: i32, %arg1: i32) -> (i32, i32, i32) {
    %c0_i32 = arith.constant 0 : i32
    %c0_i32_0 = arith.constant 0 : i32
    %c0_i32_1 = arith.constant 0 : i32
    return %arg0, %c0_i32, %c0_i32_0 : i32, i32, i32
  }
  func.func @transform_3(%arg0: i32, %arg1: i32) -> (i32, i32, i32) {
    %c0_i32 = arith.constant 0 : i32
    %c0_i32_0 = arith.constant 0 : i32
    %c0_i32_1 = arith.constant 0 : i32
    %c0_i32_2 = arith.constant 0 : i32
    return %c0_i32, %c0_i32_0, %c0_i32_1 : i32, i32, i32
  }
  func.func @transform_4(%arg0: i32, %arg1: i32) -> (i32, i32) {
    %c0_i32 = arith.constant 0 : i32
    %c0_i32_0 = arith.constant 0 : i32
    %c0_i32_1 = arith.constant 0 : i32
    return %c0_i32, %c0_i32_0 : i32, i32
  }
  func.func @transform_5(%arg0: i32, %arg1: i32) -> (i32, i32) {
    %c0_i32 = arith.constant 0 : i32
    %c0_i32_0 = arith.constant 0 : i32
    %c0_i32_1 = arith.constant 0 : i32
    return %c0_i32, %c0_i32_0 : i32, i32
  }
  func.func @transform_6(%arg0: i32, %arg1: i32) -> (i32, i32) {
    %c0_i32 = arith.constant 0 : i32
    %c0_i32_0 = arith.constant 0 : i32
    %c0_i32_1 = arith.constant 0 : i32
    return %c0_i32, %c0_i32_0 : i32, i32
  }
  func.func @transform_7(%arg0: i32, %arg1: i32) -> (i32, i32) {
    %c0_i32 = arith.constant 0 : i32
    %c0_i32_0 = arith.constant 0 : i32
    %c0_i32_1 = arith.constant 0 : i32
    return %c0_i32, %c0_i32_0 : i32, i32
  }
  func.func @transform_8(%arg0: i32, %arg1: i32) -> (i32, i32) {
    %c0_i32 = arith.constant 0 : i32
    %c0_i32_0 = arith.constant 0 : i32
    %c0_i32_1 = arith.constant 0 : i32
    return %c0_i32, %c0_i32_0 : i32, i32
  }
  func.func @transform_9(%arg0: i32, %arg1: i32) -> (i32, i32) {
    %c0_i32 = arith.constant 0 : i32
    %c0_i32_0 = arith.constant 0 : i32
    %c0_i32_1 = arith.constant 0 : i32
    return %c0_i32, %c0_i32_0 : i32, i32
  }
  func.func @transform_10(%arg0: i32, %arg1: i32) -> (i32, i32) {
    %c0_i32 = arith.constant 0 : i32
    %c0_i32_0 = arith.constant 0 : i32
    %c0_i32_1 = arith.constant 0 : i32
    return %c0_i32, %c0_i32_0 : i32, i32
  }
  func.func @transform_11(%arg0: i32, %arg1: i32) -> (i32, i32, i32) {
    %c0_i32 = arith.constant 0 : i32
    %c0_i32_0 = arith.constant 0 : i32
    return %arg0, %arg1, %c0_i32 : i32, i32, i32
  }
}

module attributes {stable_mosaic.version = 11 : i64} {
  func.func @_attn_ffn_kernel(%arg0: i32, %arg1: i32, %arg2: memref<1x8x32xf32, #tpu.memory_space<vmem>>, %arg3: memref<1x8x32xbf16, #tpu.memory_space<vmem>>, %arg4: memref<1x8x64xbf16, #tpu.memory_space<vmem>>, %arg5: memref<4x8x32xbf16, #tpu.memory_space<vmem>>, %arg6: memref<1x32xf32, #tpu.memory_space<vmem>>, %arg7: memref<1x32xf32, #tpu.memory_space<vmem>>, %arg8: memref<1x32xf32, #tpu.memory_space<vmem>>, %arg9: memref<32x64xbf16, #tpu.memory_space<vmem>>, %arg10: memref<1x64xf32, #tpu.memory_space<vmem>>, %arg11: memref<64x32xbf16, #tpu.memory_space<vmem>>, %arg12: memref<1x32xf32, #tpu.memory_space<vmem>>, %arg13: memref<1x8x32xf32, #tpu.memory_space<vmem>>) attributes {dimension_semantics = [#tpu.dimension_semantics<parallel>, #tpu.dimension_semantics<parallel>], iteration_bounds = array<i64: 2, 1>, scalar_prefetch = 0 : i64, scratch_operands = 0 : i64, tpu.core_type = #tpu.core_type<tc>, window_params = [{transform_indices = @transform_0, window_bounds = array<i64: 1, 8, 32>}, {transform_indices = @transform_1, window_bounds = array<i64: 1, 8, 32>}, {transform_indices = @transform_2, window_bounds = array<i64: 1, 8, 64>}, {pipeline_mode = #tpu.pipeline_mode<synchronous>, transform_indices = @transform_3, window_bounds = array<i64: 4, 8, 32>}, {pipeline_mode = #tpu.pipeline_mode<synchronous>, transform_indices = @transform_4, window_bounds = array<i64: 1, 32>}, {pipeline_mode = #tpu.pipeline_mode<synchronous>, transform_indices = @transform_5, window_bounds = array<i64: 1, 32>}, {pipeline_mode = #tpu.pipeline_mode<synchronous>, transform_indices = @transform_6, window_bounds = array<i64: 1, 32>}, {pipeline_mode = #tpu.pipeline_mode<synchronous>, transform_indices = @transform_7, window_bounds = array<i64: 32, 64>}, {pipeline_mode = #tpu.pipeline_mode<synchronous>, transform_indices = @transform_8, window_bounds = array<i64: 1, 64>}, {pipeline_mode = #tpu.pipeline_mode<synchronous>, transform_indices = @transform_9, window_bounds = array<i64: 64, 32>}, {pipeline_mode = #tpu.pipeline_mode<synchronous>, transform_indices = @transform_10, window_bounds = array<i64: 1, 32>}, {transform_indices = @transform_11, window_bounds = array<i64: 1, 8, 32>}]} {
    %c0 = arith.constant 0 : index
    %c0_0 = arith.constant 0 : index
    %c0_1 = arith.constant 0 : index
    %0 = vector.load %arg2[%c0, %c0_0, %c0_1] : memref<1x8x32xf32, #tpu.memory_space<vmem>>, vector<1x8x32xf32>
    %1 = vector.shape_cast %0 : vector<1x8x32xf32> to vector<8x32xf32>
    %c0_2 = arith.constant 0 : index
    %c0_3 = arith.constant 0 : index
    %c0_4 = arith.constant 0 : index
    %2 = vector.load %arg3[%c0_2, %c0_3, %c0_4] : memref<1x8x32xbf16, #tpu.memory_space<vmem>>, vector<1x8x32xbf16>
    %3 = vector.shape_cast %2 : vector<1x8x32xbf16> to vector<8x32xbf16>
    %c0_5 = arith.constant 0 : index
    %c0_6 = arith.constant 0 : index
    %c0_7 = arith.constant 0 : index
    %4 = vector.load %arg4[%c0_5, %c0_6, %c0_7] : memref<1x8x64xbf16, #tpu.memory_space<vmem>>, vector<1x8x64xbf16>
    %5 = vector.shape_cast %4 : vector<1x8x64xbf16> to vector<8x64xbf16>
    %cst = arith.constant 0.000000e+00 : f32
    %6 = vector.broadcast %cst : f32 to vector<8x32xf32>
    %7 = vector.extract_strided_slice %3 {offsets = [0, 0], sizes = [8, 8], strides = [1, 1]} : vector<8x32xbf16> to vector<8x8xbf16>
    %8 = vector.extract_strided_slice %5 {offsets = [0, 0], sizes = [8, 8], strides = [1, 1]} : vector<8x64xbf16> to vector<8x8xbf16>
    %9 = vector.extract_strided_slice %5 {offsets = [0, 32], sizes = [8, 8], strides = [1, 1]} : vector<8x64xbf16> to vector<8x8xbf16>
    %cst_8 = arith.constant dense<0.000000e+00> : vector<8x8xf32>
    %10 = tpu.matmul %7, %8, %cst_8 {dimension_numbers = #tpu.dot_dimension_numbers<[1], [1], [0], [0], [0, 0, 1, 0], [], []>} : vector<8x8xbf16>, vector<8x8xbf16>, vector<8x8xf32> -> vector<8x8xf32>
    %cst_9 = arith.constant dense<0xFF800000> : vector<8xf32>
    %11 = vector.multi_reduction <maximumf>, %10, %cst_9 [1] : vector<8x8xf32> to vector<8xf32>
    %12 = vector.shape_cast %11 : vector<8xf32> to vector<8x1xf32>
    %13 = vector.broadcast %12 : vector<8x1xf32> to vector<8x8xf32>
    %14 = arith.subf %10, %13 : vector<8x8xf32>
    %15 = math.exp %14 : vector<8x8xf32>
    %cst_10 = arith.constant dense<0.000000e+00> : vector<8xf32>
    %16 = vector.multi_reduction <add>, %15, %cst_10 [1] : vector<8x8xf32> to vector<8xf32>
    %17 = vector.shape_cast %16 : vector<8xf32> to vector<8x1xf32>
    %18 = arith.truncf %15 : vector<8x8xf32> to vector<8x8xbf16>
    %cst_11 = arith.constant dense<0.000000e+00> : vector<8x8xf32>
    %19 = tpu.matmul %18, %9, %cst_11 {dimension_numbers = #tpu.dot_dimension_numbers<[1], [0], [0], [1], [0, 0, 1, 1], [], []>} : vector<8x8xbf16>, vector<8x8xbf16>, vector<8x8xf32> -> vector<8x8xf32>
    %20 = tpu.reciprocal %17 {approx = true} : vector<8x1xf32> -> vector<8x1xf32>
    %21 = vector.broadcast %20 : vector<8x1xf32> to vector<8x8xf32>
    %22 = arith.mulf %19, %21 : vector<8x8xf32>
    %23 = arith.truncf %22 : vector<8x8xf32> to vector<8x8xbf16>
    %c0_12 = arith.constant 0 : index
    %c0_13 = arith.constant 0 : index
    %c0_14 = arith.constant 0 : index
    %24 = vector.load %arg5[%c0_12, %c0_13, %c0_14] : memref<4x8x32xbf16, #tpu.memory_space<vmem>>, vector<1x8x32xbf16>
    %25 = vector.shape_cast %24 : vector<1x8x32xbf16> to vector<8x32xbf16>
    %cst_15 = arith.constant dense<0.000000e+00> : vector<8x32xf32>
    %26 = tpu.matmul %23, %25, %cst_15 {dimension_numbers = #tpu.dot_dimension_numbers<[1], [0], [0], [1], [0, 0, 1, 1], [], []>} : vector<8x8xbf16>, vector<8x32xbf16>, vector<8x32xf32> -> vector<8x32xf32>
    %27 = arith.addf %6, %26 : vector<8x32xf32>
    %28 = vector.extract_strided_slice %3 {offsets = [0, 8], sizes = [8, 8], strides = [1, 1]} : vector<8x32xbf16> to vector<8x8xbf16>
    %29 = vector.extract_strided_slice %5 {offsets = [0, 8], sizes = [8, 8], strides = [1, 1]} : vector<8x64xbf16> to vector<8x8xbf16>
    %30 = vector.extract_strided_slice %5 {offsets = [0, 40], sizes = [8, 8], strides = [1, 1]} : vector<8x64xbf16> to vector<8x8xbf16>
    %cst_16 = arith.constant dense<0.000000e+00> : vector<8x8xf32>
    %31 = tpu.matmul %28, %29, %cst_16 {dimension_numbers = #tpu.dot_dimension_numbers<[1], [1], [0], [0], [0, 0, 1, 0], [], []>} : vector<8x8xbf16>, vector<8x8xbf16>, vector<8x8xf32> -> vector<8x8xf32>
    %cst_17 = arith.constant dense<0xFF800000> : vector<8xf32>
    %32 = vector.multi_reduction <maximumf>, %31, %cst_17 [1] : vector<8x8xf32> to vector<8xf32>
    %33 = vector.shape_cast %32 : vector<8xf32> to vector<8x1xf32>
    %34 = vector.broadcast %33 : vector<8x1xf32> to vector<8x8xf32>
    %35 = arith.subf %31, %34 : vector<8x8xf32>
    %36 = math.exp %35 : vector<8x8xf32>
    %cst_18 = arith.constant dense<0.000000e+00> : vector<8xf32>
    %37 = vector.multi_reduction <add>, %36, %cst_18 [1] : vector<8x8xf32> to vector<8xf32>
    %38 = vector.shape_cast %37 : vector<8xf32> to vector<8x1xf32>
    %39 = arith.truncf %36 : vector<8x8xf32> to vector<8x8xbf16>
    %cst_19 = arith.constant dense<0.000000e+00> : vector<8x8xf32>
    %40 = tpu.matmul %39, %30, %cst_19 {dimension_numbers = #tpu.dot_dimension_numbers<[1], [0], [0], [1], [0, 0, 1, 1], [], []>} : vector<8x8xbf16>, vector<8x8xbf16>, vector<8x8xf32> -> vector<8x8xf32>
    %41 = tpu.reciprocal %38 {approx = true} : vector<8x1xf32> -> vector<8x1xf32>
    %42 = vector.broadcast %41 : vector<8x1xf32> to vector<8x8xf32>
    %43 = arith.mulf %40, %42 : vector<8x8xf32>
    %44 = arith.truncf %43 : vector<8x8xf32> to vector<8x8xbf16>
    %c1 = arith.constant 1 : index
    %c0_20 = arith.constant 0 : index
    %c0_21 = arith.constant 0 : index
    %45 = vector.load %arg5[%c1, %c0_20, %c0_21] : memref<4x8x32xbf16, #tpu.memory_space<vmem>>, vector<1x8x32xbf16>
    %46 = vector.shape_cast %45 : vector<1x8x32xbf16> to vector<8x32xbf16>
    %cst_22 = arith.constant dense<0.000000e+00> : vector<8x32xf32>
    %47 = tpu.matmul %44, %46, %cst_22 {dimension_numbers = #tpu.dot_dimension_numbers<[1], [0], [0], [1], [0, 0, 1, 1], [], []>} : vector<8x8xbf16>, vector<8x32xbf16>, vector<8x32xf32> -> vector<8x32xf32>
    %48 = arith.addf %27, %47 : vector<8x32xf32>
    %49 = vector.extract_strided_slice %3 {offsets = [0, 16], sizes = [8, 8], strides = [1, 1]} : vector<8x32xbf16> to vector<8x8xbf16>
    %50 = vector.extract_strided_slice %5 {offsets = [0, 16], sizes = [8, 8], strides = [1, 1]} : vector<8x64xbf16> to vector<8x8xbf16>
    %51 = vector.extract_strided_slice %5 {offsets = [0, 48], sizes = [8, 8], strides = [1, 1]} : vector<8x64xbf16> to vector<8x8xbf16>
    %cst_23 = arith.constant dense<0.000000e+00> : vector<8x8xf32>
    %52 = tpu.matmul %49, %50, %cst_23 {dimension_numbers = #tpu.dot_dimension_numbers<[1], [1], [0], [0], [0, 0, 1, 0], [], []>} : vector<8x8xbf16>, vector<8x8xbf16>, vector<8x8xf32> -> vector<8x8xf32>
    %cst_24 = arith.constant dense<0xFF800000> : vector<8xf32>
    %53 = vector.multi_reduction <maximumf>, %52, %cst_24 [1] : vector<8x8xf32> to vector<8xf32>
    %54 = vector.shape_cast %53 : vector<8xf32> to vector<8x1xf32>
    %55 = vector.broadcast %54 : vector<8x1xf32> to vector<8x8xf32>
    %56 = arith.subf %52, %55 : vector<8x8xf32>
    %57 = math.exp %56 : vector<8x8xf32>
    %cst_25 = arith.constant dense<0.000000e+00> : vector<8xf32>
    %58 = vector.multi_reduction <add>, %57, %cst_25 [1] : vector<8x8xf32> to vector<8xf32>
    %59 = vector.shape_cast %58 : vector<8xf32> to vector<8x1xf32>
    %60 = arith.truncf %57 : vector<8x8xf32> to vector<8x8xbf16>
    %cst_26 = arith.constant dense<0.000000e+00> : vector<8x8xf32>
    %61 = tpu.matmul %60, %51, %cst_26 {dimension_numbers = #tpu.dot_dimension_numbers<[1], [0], [0], [1], [0, 0, 1, 1], [], []>} : vector<8x8xbf16>, vector<8x8xbf16>, vector<8x8xf32> -> vector<8x8xf32>
    %62 = tpu.reciprocal %59 {approx = true} : vector<8x1xf32> -> vector<8x1xf32>
    %63 = vector.broadcast %62 : vector<8x1xf32> to vector<8x8xf32>
    %64 = arith.mulf %61, %63 : vector<8x8xf32>
    %65 = arith.truncf %64 : vector<8x8xf32> to vector<8x8xbf16>
    %c2 = arith.constant 2 : index
    %c0_27 = arith.constant 0 : index
    %c0_28 = arith.constant 0 : index
    %66 = vector.load %arg5[%c2, %c0_27, %c0_28] : memref<4x8x32xbf16, #tpu.memory_space<vmem>>, vector<1x8x32xbf16>
    %67 = vector.shape_cast %66 : vector<1x8x32xbf16> to vector<8x32xbf16>
    %cst_29 = arith.constant dense<0.000000e+00> : vector<8x32xf32>
    %68 = tpu.matmul %65, %67, %cst_29 {dimension_numbers = #tpu.dot_dimension_numbers<[1], [0], [0], [1], [0, 0, 1, 1], [], []>} : vector<8x8xbf16>, vector<8x32xbf16>, vector<8x32xf32> -> vector<8x32xf32>
    %69 = arith.addf %48, %68 : vector<8x32xf32>
    %70 = vector.extract_strided_slice %3 {offsets = [0, 24], sizes = [8, 8], strides = [1, 1]} : vector<8x32xbf16> to vector<8x8xbf16>
    %71 = vector.extract_strided_slice %5 {offsets = [0, 24], sizes = [8, 8], strides = [1, 1]} : vector<8x64xbf16> to vector<8x8xbf16>
    %72 = vector.extract_strided_slice %5 {offsets = [0, 56], sizes = [8, 8], strides = [1, 1]} : vector<8x64xbf16> to vector<8x8xbf16>
    %cst_30 = arith.constant dense<0.000000e+00> : vector<8x8xf32>
    %73 = tpu.matmul %70, %71, %cst_30 {dimension_numbers = #tpu.dot_dimension_numbers<[1], [1], [0], [0], [0, 0, 1, 0], [], []>} : vector<8x8xbf16>, vector<8x8xbf16>, vector<8x8xf32> -> vector<8x8xf32>
    %cst_31 = arith.constant dense<0xFF800000> : vector<8xf32>
    %74 = vector.multi_reduction <maximumf>, %73, %cst_31 [1] : vector<8x8xf32> to vector<8xf32>
    %75 = vector.shape_cast %74 : vector<8xf32> to vector<8x1xf32>
    %76 = vector.broadcast %75 : vector<8x1xf32> to vector<8x8xf32>
    %77 = arith.subf %73, %76 : vector<8x8xf32>
    %78 = math.exp %77 : vector<8x8xf32>
    %cst_32 = arith.constant dense<0.000000e+00> : vector<8xf32>
    %79 = vector.multi_reduction <add>, %78, %cst_32 [1] : vector<8x8xf32> to vector<8xf32>
    %80 = vector.shape_cast %79 : vector<8xf32> to vector<8x1xf32>
    %81 = arith.truncf %78 : vector<8x8xf32> to vector<8x8xbf16>
    %cst_33 = arith.constant dense<0.000000e+00> : vector<8x8xf32>
    %82 = tpu.matmul %81, %72, %cst_33 {dimension_numbers = #tpu.dot_dimension_numbers<[1], [0], [0], [1], [0, 0, 1, 1], [], []>} : vector<8x8xbf16>, vector<8x8xbf16>, vector<8x8xf32> -> vector<8x8xf32>
    %83 = tpu.reciprocal %80 {approx = true} : vector<8x1xf32> -> vector<8x1xf32>
    %84 = vector.broadcast %83 : vector<8x1xf32> to vector<8x8xf32>
    %85 = arith.mulf %82, %84 : vector<8x8xf32>
    %86 = arith.truncf %85 : vector<8x8xf32> to vector<8x8xbf16>
    %c3 = arith.constant 3 : index
    %c0_34 = arith.constant 0 : index
    %c0_35 = arith.constant 0 : index
    %87 = vector.load %arg5[%c3, %c0_34, %c0_35] : memref<4x8x32xbf16, #tpu.memory_space<vmem>>, vector<1x8x32xbf16>
    %88 = vector.shape_cast %87 : vector<1x8x32xbf16> to vector<8x32xbf16>
    %cst_36 = arith.constant dense<0.000000e+00> : vector<8x32xf32>
    %89 = tpu.matmul %86, %88, %cst_36 {dimension_numbers = #tpu.dot_dimension_numbers<[1], [0], [0], [1], [0, 0, 1, 1], [], []>} : vector<8x8xbf16>, vector<8x32xbf16>, vector<8x32xf32> -> vector<8x32xf32>
    %90 = arith.addf %69, %89 : vector<8x32xf32>
    %91 = arith.addf %1, %90 : vector<8x32xf32>
    %c0_37 = arith.constant 0 : index
    %c0_38 = arith.constant 0 : index
    %92 = vector.load %arg6[%c0_37, %c0_38] : memref<1x32xf32, #tpu.memory_space<vmem>>, vector<1x32xf32>
    %93 = vector.broadcast %92 : vector<1x32xf32> to vector<8x32xf32>
    %94 = arith.addf %91, %93 : vector<8x32xf32>
    %c0_39 = arith.constant 0 : index
    %c0_40 = arith.constant 0 : index
    %95 = vector.load %arg7[%c0_39, %c0_40] : memref<1x32xf32, #tpu.memory_space<vmem>>, vector<1x32xf32>
    %c0_41 = arith.constant 0 : index
    %c0_42 = arith.constant 0 : index
    %96 = vector.load %arg8[%c0_41, %c0_42] : memref<1x32xf32, #tpu.memory_space<vmem>>, vector<1x32xf32>
    %cst_43 = arith.constant dense<0.000000e+00> : vector<8xf32>
    %97 = vector.multi_reduction <add>, %94, %cst_43 [1] : vector<8x32xf32> to vector<8xf32>
    %98 = vector.shape_cast %97 : vector<8xf32> to vector<8x1xf32>
    %cst_44 = arith.constant 3.200000e+01 : f32
    %99 = vector.broadcast %cst_44 : f32 to vector<8x1xf32>
    %100 = arith.divf %98, %99 : vector<8x1xf32>
    %101 = vector.broadcast %100 : vector<8x1xf32> to vector<8x32xf32>
    %102 = arith.subf %94, %101 : vector<8x32xf32>
    %103 = arith.mulf %102, %102 : vector<8x32xf32>
    %cst_45 = arith.constant dense<0.000000e+00> : vector<8xf32>
    %104 = vector.multi_reduction <add>, %103, %cst_45 [1] : vector<8x32xf32> to vector<8xf32>
    %105 = vector.shape_cast %104 : vector<8xf32> to vector<8x1xf32>
    %cst_46 = arith.constant 3.200000e+01 : f32
    %106 = vector.broadcast %cst_46 : f32 to vector<8x1xf32>
    %107 = arith.divf %105, %106 : vector<8x1xf32>
    %cst_47 = arith.constant 9.99999974E-6 : f32
    %108 = vector.broadcast %cst_47 : f32 to vector<8x1xf32>
    %109 = arith.addf %107, %108 : vector<8x1xf32>
    %110 = math.rsqrt %109 : vector<8x1xf32>
    %111 = vector.broadcast %110 : vector<8x1xf32> to vector<8x32xf32>
    %112 = arith.mulf %102, %111 : vector<8x32xf32>
    %113 = vector.broadcast %95 : vector<1x32xf32> to vector<8x32xf32>
    %114 = arith.mulf %112, %113 : vector<8x32xf32>
    %115 = vector.broadcast %96 : vector<1x32xf32> to vector<8x32xf32>
    %116 = arith.addf %114, %115 : vector<8x32xf32>
    %117 = arith.truncf %116 : vector<8x32xf32> to vector<8x32xbf16>
    %c0_48 = arith.constant 0 : index
    %c0_49 = arith.constant 0 : index
    %118 = vector.load %arg9[%c0_48, %c0_49] : memref<32x64xbf16, #tpu.memory_space<vmem>>, vector<32x64xbf16>
    %cst_50 = arith.constant dense<0.000000e+00> : vector<8x64xf32>
    %119 = tpu.matmul %117, %118, %cst_50 {dimension_numbers = #tpu.dot_dimension_numbers<[1], [0], [0], [1], [0, 0, 1, 1], [], []>} : vector<8x32xbf16>, vector<32x64xbf16>, vector<8x64xf32> -> vector<8x64xf32>
    %c0_51 = arith.constant 0 : index
    %c0_52 = arith.constant 0 : index
    %120 = vector.load %arg10[%c0_51, %c0_52] : memref<1x64xf32, #tpu.memory_space<vmem>>, vector<1x64xf32>
    %121 = vector.broadcast %120 : vector<1x64xf32> to vector<8x64xf32>
    %122 = arith.addf %119, %121 : vector<8x64xf32>
    %cst_53 = arith.constant 5.000000e-01 : f32
    %123 = vector.broadcast %cst_53 : f32 to vector<8x64xf32>
    %124 = arith.mulf %123, %122 : vector<8x64xf32>
    %cst_54 = arith.constant 0.707106769 : f32
    %125 = vector.broadcast %cst_54 : f32 to vector<8x64xf32>
    %126 = arith.mulf %122, %125 : vector<8x64xf32>
    %127 = math.erf %126 : vector<8x64xf32>
    %cst_55 = arith.constant 1.000000e+00 : f32
    %128 = vector.broadcast %cst_55 : f32 to vector<8x64xf32>
    %129 = arith.addf %128, %127 : vector<8x64xf32>
    %130 = arith.mulf %124, %129 : vector<8x64xf32>
    %131 = arith.truncf %130 : vector<8x64xf32> to vector<8x64xbf16>
    %c0_56 = arith.constant 0 : index
    %c0_57 = arith.constant 0 : index
    %132 = vector.load %arg11[%c0_56, %c0_57] : memref<64x32xbf16, #tpu.memory_space<vmem>>, vector<64x32xbf16>
    %cst_58 = arith.constant dense<0.000000e+00> : vector<8x32xf32>
    %133 = tpu.matmul %131, %132, %cst_58 {dimension_numbers = #tpu.dot_dimension_numbers<[1], [0], [0], [1], [0, 0, 1, 1], [], []>} : vector<8x64xbf16>, vector<64x32xbf16>, vector<8x32xf32> -> vector<8x32xf32>
    %c0_59 = arith.constant 0 : index
    %c0_60 = arith.constant 0 : index
    %134 = vector.load %arg12[%c0_59, %c0_60] : memref<1x32xf32, #tpu.memory_space<vmem>>, vector<1x32xf32>
    %135 = vector.broadcast %134 : vector<1x32xf32> to vector<8x32xf32>
    %136 = arith.addf %133, %135 : vector<8x32xf32>
    %137 = arith.addf %94, %136 : vector<8x32xf32>
    %c0_61 = arith.constant 0 : index
    %c0_62 = arith.constant 0 : index
    %c0_63 = arith.constant 0 : index
    %138 = vector.load %arg13[%c0_61, %c0_62, %c0_63] : memref<1x8x32xf32, #tpu.memory_space<vmem>>, vector<1x8x32xf32>
    %139 = vector.shape_cast %138 : vector<1x8x32xf32> to vector<8x32xf32>
    %140 = vector.shape_cast %137 : vector<8x32xf32> to vector<1x8x32xf32>
    tpu.vector_store %arg13[%c0_61, %c0_62, %c0_63], %140 {strides = array<i32>} : memref<1x8x32xf32, #tpu.memory_space<vmem>>, vector<1x8x32xf32>,
    return
  }
  func.func @transform_0(%arg0: i32, %arg1: i32) -> (i32, i32, i32) {
    %c0_i32 = arith.constant 0 : i32
    %c0_i32_0 = arith.constant 0 : i32
    return %arg0, %arg1, %c0_i32 : i32, i32, i32
  }
  func.func @transform_1(%arg0: i32, %arg1: i32) -> (i32, i32, i32) {
    %c0_i32 = arith.constant 0 : i32
    %c0_i32_0 = arith.constant 0 : i32
    return %arg0, %arg1, %c0_i32 : i32, i32, i32
  }
  func.func @transform_2(%arg0: i32, %arg1: i32) -> (i32, i32, i32) {
    %c0_i32 = arith.constant 0 : i32
    %c0_i32_0 = arith.constant 0 : i32
    %c0_i32_1 = arith.constant 0 : i32
    return %arg0, %c0_i32, %c0_i32_0 : i32, i32, i32
  }
  func.func @transform_3(%arg0: i32, %arg1: i32) -> (i32, i32, i32) {
    %c0_i32 = arith.constant 0 : i32
    %c0_i32_0 = arith.constant 0 : i32
    %c0_i32_1 = arith.constant 0 : i32
    %c0_i32_2 = arith.constant 0 : i32
    return %c0_i32, %c0_i32_0, %c0_i32_1 : i32, i32, i32
  }
  func.func @transform_4(%arg0: i32, %arg1: i32) -> (i32, i32) {
    %c0_i32 = arith.constant 0 : i32
    %c0_i32_0 = arith.constant 0 : i32
    %c0_i32_1 = arith.constant 0 : i32
    return %c0_i32, %c0_i32_0 : i32, i32
  }
  func.func @transform_5(%arg0: i32, %arg1: i32) -> (i32, i32) {
    %c0_i32 = arith.constant 0 : i32
    %c0_i32_0 = arith.constant 0 : i32
    %c0_i32_1 = arith.constant 0 : i32
    return %c0_i32, %c0_i32_0 : i32, i32
  }
  func.func @transform_6(%arg0: i32, %arg1: i32) -> (i32, i32) {
    %c0_i32 = arith.constant 0 : i32
    %c0_i32_0 = arith.constant 0 : i32
    %c0_i32_1 = arith.constant 0 : i32
    return %c0_i32, %c0_i32_0 : i32, i32
  }
  func.func @transform_7(%arg0: i32, %arg1: i32) -> (i32, i32) {
    %c0_i32 = arith.constant 0 : i32
    %c0_i32_0 = arith.constant 0 : i32
    %c0_i32_1 = arith.constant 0 : i32
    return %c0_i32, %c0_i32_0 : i32, i32
  }
  func.func @transform_8(%arg0: i32, %arg1: i32) -> (i32, i32) {
    %c0_i32 = arith.constant 0 : i32
    %c0_i32_0 = arith.constant 0 : i32
    %c0_i32_1 = arith.constant 0 : i32
    return %c0_i32, %c0_i32_0 : i32, i32
  }
  func.func @transform_9(%arg0: i32, %arg1: i32) -> (i32, i32) {
    %c0_i32 = arith.constant 0 : i32
    %c0_i32_0 = arith.constant 0 : i32
    %c0_i32_1 = arith.constant 0 : i32
    return %c0_i32, %c0_i32_0 : i32, i32
  }
  func.func @transform_10(%arg0: i32, %arg1: i32) -> (i32, i32) {
    %c0_i32 = arith.constant 0 : i32
    %c0_i32_0 = arith.constant 0 : i32
    %c0_i32_1 = arith.constant 0 : i32
    return %c0_i32, %c0_i32_0 : i32, i32
  }
  func.func @transform_11(%arg0: i32, %arg1: i32) -> (i32, i32, i32) {
    %c0_i32 = arith.constant 0 : i32
    %c0_i32_0 = arith.constant 0 : i32
    return %arg0, %arg1, %c0_i32 : i32, i32, i32
  }
}

</mosaic_0001>

<bundles_post_ra>
// kernel: transformer_forward.4
= control target key start
LH: loop header
LB: loop body
LE: loop exit
PB: predicated region body
PF: predicated region fallthrough
CT: control target
= control target key end

     0   :  { %11 = vsyncpa [#allocation3], 0  ;;  %s839_s0 = inlined_call_operand.vmem [shape: f32[2,8,32], index: 0, kind: input, shape index: {}]   ;;  %s840_s1 = inlined_call_operand.hbm [shape: f32[1,32], index: 1, kind: input, shape index: {}]   ;;  %s841_s2 = inlined_call_operand.hbm [shape: f32[1,32], index: 2, kind: input, shape index: {}]   ;;  %s842_s3 = inlined_call_operand.vmem [shape: bf16[32,96], index: 3, kind: input, shape index: {}]   ;;  %s843_s4 = inlined_call_operand.vmem [shape: bf16[2,8,32], index: 4, kind: output, shape index: {0}]   ;;  %s844_s5 = inlined_call_operand.vmem [shape: bf16[2,8,64], index: 5, kind: output, shape index: {1}]  }
   0x1   :  { %12 = vsyncpa [#allocation5], 0  ;;  %s741_s18 = smov 0   ;;  %s743_s19 = smov 0  }
   0x2   :  { %s745_s20 = smov 0  }
   0x3 LB: > { %s538_s21 = sadd.s32 4294967295, %s704_s20   ;;  %s30_s22 = sadd.s32 1, %s700_s19  ;;  %s704_s20 = sphi %s745_s20, %s18_s20   ;;  %s700_s19 = sphi %s743_s19, %s852_s19   ;;  %s696_s18 = sphi %s741_s18, %s851_s18  }
   0x4   : > { %p32_p0 = scmp.ge.s32.totalorder %s30_s22, 2  ;;  %p540_p1 = scmp.ge.s32.totalorder %s704_s20, 1 }
   0x5   : > { %p182_p2 = scmp.lt.s32.totalorder %s704_s20, 3  ;;  %p766_p4 = scmp.eq.s32.totalorder %s538_s21, 0 }
   0x6   : > { %s854_s22 = smov (%p32_p0, %s30_s22), 0  ;;  %s706_s25 = smov [#allocation2]  }
   0x7   : > { %p762_p3 = pnand %p540_p1, %p182_p2  ;;  %s195_s26 = sshll.u32 %s706_s25, 4  ;;  %s196_s26 = int_to_ptr.vmem [resolvable:$true] %s195_s26 }
   0x8   : > { %s848_s24 = scalar_select %p766_p4, 1, 0 }
   0x9   : > { %p578_p5 = pneg %p762_p3  ;;  %s707_s27 = smov [#allocation4]  }
   0xa   : > { %s206_s28 = sshll.u32 %s707_s27, 4  ;;  %s633_s30 = scalar_lea.vmem %s196_s26, 16  ;;  %s207_s28 = int_to_ptr.vmem [resolvable:$true] %s206_s28 }
   0xb   : > { %p774_p6 = pnand %p766_p4, %p578_p5  ;;  %p634_p8 = scmp.ne.s32.totalorder %s196_s26, %s633_s30 }
   0xc   : > { %s640_s6 = scalar_lea.vmem %s196_s26, 32  ;;  %p641_p11 = scmp.lt.s32.totalorder %s196_s26, %s196_s26 }
   0xd   : > { %p624_p7 = pneg %p774_p6  ;;  %p642_p12 = scmp.lt.s32.totalorder %s640_s6, %s633_s30 }
   0xf   : > { %p636_p9 = pnand %p634_p8, %p624_p7  ;;  %p643_p13 = por %p642_p12, %p641_p11 }
  0x11   : > { %p637_p10 = pneg %p636_p9 }
  0x13   : > { %p644_p0 = pnand %p643_p13, %p637_p10 }
  0x15   : > { %647 = shalt.err (!%p644_p0)
}
  0x16   : > { %581 = dma.hbm_to_vmem [thread:$0]  (!%p774_p6), %s840_s1, 16, %s196_s26, [#allocation3]  }
  0x17   : > { %s659_s9 = scalar_lea.vmem %s207_s28, 16  ;;  %s666_s10 = scalar_lea.vmem %s207_s28, 32 }
  0x18   : > { %p660_p1 = scmp.ne.s32.totalorder %s207_s28, %s659_s9  ;;  %p667_p8 = scmp.lt.s32.totalorder %s207_s28, %s207_s28 }
  0x19   : > { %p668_p9 = scmp.lt.s32.totalorder %s666_s10, %s659_s9 }
  0x1a   : > { %p662_p2 = pnand %p660_p1, %p624_p7 }
  0x1b   : > { %p669_p4 = por %p668_p9, %p667_p8 }
  0x1c   : > { %p663_p5 = pneg %p662_p2 }
  0x1e   : > { %p670_p11 = pnand %p669_p4, %p663_p5 }
  0x20   : > { %673 = shalt.err (!%p670_p11)
}
  0x21   : > { %584 = dma.hbm_to_vmem [thread:$0]  (!%p774_p6), %s841_s2, 16, %s207_s28, [#allocation5]  }
  0x22   : > { %232 = sbr.rel (%p762_p3) target bundleno = 669 (0x29d), region = 36  ;;  %p850_p10 = scmp.ne.s32.totalorder (!%p762_p3), %s848_s24, 0 }
  0x27   : > { %687 = dma.done.wait (%p850_p10), [#allocation3], 16  }
  0x28   : > { %689 = vsyncadd (%p850_p10), [#allocation3], 4294967280 }
  0x29   : > { %691 = dma.done.wait (%p850_p10), [#allocation5], 16  }
  0x2a   : > { %693 = vsyncadd (%p850_p10), [#allocation5], 4294967280  ;;  %p275_p4 = scmp.lt.s32.totalorder %s696_s18, 1  ;;  %vm300_vm0 = vcmask 261120   ;;  %v618_v7 = vld [vmem:[%s842_s3 + $0x8] sm:$0xff]   ;;  %v708_v8 = vmov 0.0  }
  0x2b   : > { %562 = vmatprep.subr.bf16.mxu0 %v708_v8  ;;  %vm709_vm1 = vmmov 0   ;;  %v619_v9 = vld [vmem:[%s842_s3] sm:$0xff]   ;;  %vm390_vm2 = vcmask 257024   ;;  %s710_s29 = smov 96   ;;  %vm398_vm3 = vcmask 519168  }
  0x2c   : > { %s856_s18 = smov (!%p275_p4, %s696_s18), 1  ;;  %566 = vmatprep.mubr.msk.bf16.mxu0 %vm709_vm1, %v708_v8  ;;  %563 = vmatpush3.bf16.msra.mxu0 %v618_v7  ;;  %v550_v14 = vld [vmem:[#allocation2] ss:$0 sm:$0xff]  ;;  %v551_v16 = vld [vmem:[#allocation4] ss:$0 sm:$0xff] }
  0x2d   : > { %s547_s13 = sshll.u32 %s856_s18, 3  ;;  %564 = vmatprep.subr.bf16.mxu0 %v708_v8  ;;  %s548_s25 = sshll.u32 %s856_s18, 2 }
  0x2e   : > { %s281_s16 = scalar_lea.vmem %s839_s0, %s547_s13  ;;  %s288_s28 = scalar_lea.vmem %s843_s4, %s548_s25 }
  0x2f   : > { %v297_v0 = vld [vmem:[%s281_s16] sm:$0xff]  ;;  %s295_s7 = scalar_lea.vmem %s844_s5, %s548_s25 }
  0x30   : > { %v301_v1 = vsel %vm300_vm0, %v297_v0, 0.0  ;;  %565 = vmatpush3.bf16.msra.mxu0 %v619_v9 }
  0x31   : > { %302 = vadd.xlane.f32.xlu0 %v301_v1 }
  0xba   : > { %v303_v2 = vpop.xlane.xlu0 %302 }
  0xbb   : > { %v305_v3 = vmul.f32 0.03125, %v303_v2 }
  0xbd   : > { %v306_v4 = vsub.f32 %v297_v0, %v305_v3 }
  0xbf   : > { %v307_v5 = vmul.f32 %v306_v4, %v306_v4 }
  0xc1   : > { %v308_v6 = vsel %vm300_vm0, %v307_v5, 0.0 }
  0xc2   : > { %309 = vadd.xlane.f32.xlu0 %v308_v6 }
 0x14b   : > { %v310_v10 = vpop.xlane.xlu0 %309 }
 0x14c   : > { %v311_v11 = vmul.f32 0.03125, %v310_v10 }
 0x14e   : > { %v312_v12 = vadd.f32 1e-05, %v311_v11 }
 0x150   : > { %620 = vrsqrt.f32 %v312_v12 }
 0x15d   : > { %v621_v13 = vpop.eup %620 }
 0x15e   : > { %v314_v15 = vmul.f32 %v621_v13, %v306_v4 }
 0x160   : > { %v321_v17 = vmul.f32 %v550_v14, %v314_v15 }
 0x162   : > { %v328_v18 = vadd.f32 %v551_v16, %v321_v17 }
 0x164   : > { %v329_v19 = vpack.c.bf16 %v328_v18, %v328_v18 }
 0x166   : > { %567 = vmatmul.mubr.msk.bf16.vlgmr.msra.gmra.mxu0 %vm300_vm0, %v329_v19 }
 0x226   : > { %v383_v20 = vpop.f32.mrf.mxu0 }
 0x227   : > { %v389_v21 = vpack.c.bf16 %v383_v20, %v383_v20 }
 0x228   : > { %v568_v22 = vpop.f32.mrf.mxu0 }
 0x229   : > { %391 = vst.msk [vmem:[%s288_s28] sm:$0xf] %vm390_vm2, %v389_v21  ;;  %395 = vrot.lane.b32.xlu1 %v389_v21, %s710_s29 }
 0x22a   : > { %v386_v23 = vpop.f32.mrf.mxu0 }
 0x22c   : > { %v569_v24 = vpop.f32.mrf.mxu0 }
 0x29b   : > { %v396_v25 = vpop.permute.xlu1 %395 }
 0x29c   : > { %399 = vst.msk [vmem:[%s295_s7] sm:$0xf] %vm398_vm3, %v396_v25 }
 0x29d PF: > { %s18_s20 = sadd.s32 1, %s704_s20   ;;  %s851_s18 = smov %s700_s19 }
 0x29e   : > { %p15_p3 = scmp.ge.s32.totalorder %s18_s20, 4   ;;  %s852_s19 = smov %s854_s22 }
 0x2a0   :  { %17 = sbr.rel (!%p15_p3) target bundleno = 3 (0x3), region = 87 }
 0x2a5   :  { %445 = vsyncpa [#allocation3], 1 }
 0x2a6   :  { %447 = vsyncpa [#allocation3 + $0x1], 1 }
 0x2a7   :  { %448 = vsyncpa [#allocation5], 1 }

// kernel: transformer_forward.6
= control target key start
LH: loop header
LB: loop body
LE: loop exit
PB: predicated region body
PF: predicated region fallthrough
CT: control target
= control target key end

     0   :  { %s605_s18 = smov 0   ;;  %s607_s19 = smov 0   ;;  %s660_s0 = inlined_call_operand.vmem [shape: f32[2,8,32], index: 0, kind: input, shape index: {}]   ;;  %s661_s1 = inlined_call_operand.vmem [shape: f32[1,32], index: 1, kind: input, shape index: {}]   ;;  %s662_s2 = inlined_call_operand.vmem [shape: f32[1,32], index: 2, kind: input, shape index: {}]   ;;  %s663_s3 = inlined_call_operand.vmem [shape: bf16[32,96], index: 3, kind: input, shape index: {}]   ;;  %s664_s4 = inlined_call_operand.vmem [shape: bf16[2,8,32], index: 4, kind: output, shape index: {0}]   ;;  %s665_s5 = inlined_call_operand.vmem [shape: bf16[2,8,64], index: 5, kind: output, shape index: {1}]  }
   0x1   :  { %s609_s20 = smov 0  }
   0x2 LB: > { %s28_s21 = sadd.s32 1, %s566_s19  ;;  %p493_p0 = scmp.ge.s32.totalorder %s570_s20, 1  ;;  %s570_s20 = sphi %s609_s20, %s16_s20   ;;  %s566_s19 = sphi %s607_s19, %s667_s19   ;;  %s562_s18 = sphi %s605_s18, %s666_s18  }
   0x3   : > { %p30_p1 = scmp.ge.s32.totalorder %s28_s21, 2  ;;  %p210_p2 = scmp.lt.s32.totalorder %s570_s20, 3 }
   0x5   : > { %s669_s21 = smov (%p30_p1, %s28_s21), 0  ;;  %p211_p3 = pnand %p493_p0, %p210_p2 }
   0x6   : > { %p249_p4 = scmp.lt.s32.totalorder (!%p211_p3), %s562_s18, 1  ;;  %s574_s13 = smov (!%p211_p3), 96  }
   0x7   : > { %214 = sbr.rel (%p211_p3) target bundleno = 637 (0x27d), region = 36 }
   0xc   : > { %s671_s18 = smov (!%p249_p4, %s562_s18), 1  ;;  %vm274_vm0 = vcmask 261120   ;;  %v544_v7 = vld [vmem:[%s663_s3 + $0x8] sm:$0xff]   ;;  %v572_v8 = vmov 0.0   ;;  %vm573_vm1 = vmmov 0   ;;  %v545_v9 = vld [vmem:[%s663_s3] sm:$0xff]  }
   0xd   : > { %s494_s22 = sshll.u32 %s671_s18, 3  ;;  %509 = vmatprep.subr.bf16.mxu0 %v572_v8  ;;  %513 = vmatprep.mubr.msk.bf16.mxu0 %vm573_vm1, %v572_v8  ;;  %v497_v14 = vld [vmem:[%s661_s1] ss:$0 sm:$0xff]  ;;  %s495_s9 = sshll.u32 %s671_s18, 2  ;;  %vm364_vm2 = vcmask 257024   ;;  %vm372_vm3 = vcmask 519168  }
   0xe   : > { %s255_s25 = scalar_lea.vmem %s660_s0, %s494_s22  ;;  %510 = vmatpush3.bf16.msra.mxu0 %v544_v7  ;;  %v498_v16 = vld [vmem:[%s662_s2] ss:$0 sm:$0xff]  ;;  %s262_s12 = scalar_lea.vmem %s664_s4, %s495_s9 }
   0xf   : > { %v271_v0 = vld [vmem:[%s255_s25] sm:$0xff]  ;;  %511 = vmatprep.subr.bf16.mxu0 %v572_v8  ;;  %s269_s16 = scalar_lea.vmem %s665_s5, %s495_s9 }
  0x10   : > { %v275_v1 = vsel %vm274_vm0, %v271_v0, 0.0 }
  0x11   : > { %276 = vadd.xlane.f32.xlu0 %v275_v1 }
  0x12   : > { %512 = vmatpush3.bf16.msra.mxu0 %v545_v9 }
  0x9a   : > { %v277_v2 = vpop.xlane.xlu0 %276 }
  0x9b   : > { %v279_v3 = vmul.f32 0.03125, %v277_v2 }
  0x9d   : > { %v280_v4 = vsub.f32 %v271_v0, %v279_v3 }
  0x9f   : > { %v281_v5 = vmul.f32 %v280_v4, %v280_v4 }
  0xa1   : > { %v282_v6 = vsel %vm274_vm0, %v281_v5, 0.0 }
  0xa2   : > { %283 = vadd.xlane.f32.xlu0 %v282_v6 }
 0x12b   : > { %v284_v10 = vpop.xlane.xlu0 %283 }
 0x12c   : > { %v285_v11 = vmul.f32 0.03125, %v284_v10 }
 0x12e   : > { %v286_v12 = vadd.f32 1e-05, %v285_v11 }
 0x130   : > { %546 = vrsqrt.f32 %v286_v12 }
 0x13d   : > { %v547_v13 = vpop.eup %546 }
 0x13e   : > { %v288_v15 = vmul.f32 %v547_v13, %v280_v4 }
 0x140   : > { %v295_v17 = vmul.f32 %v497_v14, %v288_v15 }
 0x142   : > { %v302_v18 = vadd.f32 %v498_v16, %v295_v17 }
 0x144   : > { %v303_v19 = vpack.c.bf16 %v302_v18, %v302_v18 }
 0x146   : > { %514 = vmatmul.mubr.msk.bf16.vlgmr.msra.gmra.mxu0 %vm274_vm0, %v303_v19 }
 0x206   : > { %v357_v20 = vpop.f32.mrf.mxu0 }
 0x207   : > { %v363_v21 = vpack.c.bf16 %v357_v20, %v357_v20 }
 0x208   : > { %v515_v22 = vpop.f32.mrf.mxu0 }
 0x209   : > { %365 = vst.msk [vmem:[%s262_s12] sm:$0xf] %vm364_vm2, %v363_v21  ;;  %369 = vrot.lane.b32.xlu1 %v363_v21, %s574_s13 }
 0x20a   : > { %v360_v23 = vpop.f32.mrf.mxu0 }
 0x20c   : > { %v516_v24 = vpop.f32.mrf.mxu0 }
 0x27b   : > { %v370_v25 = vpop.permute.xlu1 %369 }
 0x27c   : > { %373 = vst.msk [vmem:[%s269_s16] sm:$0xf] %vm372_vm3, %v370_v25 }
 0x27d PF: > { %s16_s20 = sadd.s32 1, %s570_s20   ;;  %s666_s18 = smov %s566_s19 }
 0x27e   : > { %p13_p5 = scmp.ge.s32.totalorder %s16_s20, 4   ;;  %s667_s19 = smov %s669_s21 }
 0x280   :  { %15 = sbr.rel (!%p13_p5) target bundleno = 2 (0x2), region = 78 }

// kernel: transformer_forward.5
= control target key start
LH: loop header
LB: loop body
LE: loop exit
PB: predicated region body
PF: predicated region fallthrough
CT: control target
= control target key end

     0   :  { %s1721_s17 = smov 0   ;;  %s1723_s18 = smov 0   ;;  %s1915_s0 = inlined_call_operand.vmem [shape: f32[2,8,32], index: 0, kind: input, shape index: {}]   ;;  %s1916_s1 = inlined_call_operand.vmem [shape: bf16[2,8,32], index: 1, kind: input, shape index: {}]   ;;  %s1917_s2 = inlined_call_operand.vmem [shape: bf16[2,8,64], index: 2, kind: input, shape index: {}]   ;;  %s1918_s3 = inlined_call_operand.vmem [shape: bf16[4,8,32], index: 3, kind: input, shape index: {}]   ;;  %s1919_s4 = inlined_call_operand.vmem [shape: f32[1,32], index: 4, kind: input, shape index: {}]   ;;  %s1920_s5 = inlined_call_operand.vmem [shape: f32[1,32], index: 5, kind: input, shape index: {}]   ;;  %s1921_s6 = inlined_call_operand.vmem [shape: f32[1,32], index: 6, kind: input, shape index: {}]   ;;  %s1922_s7 = inlined_call_operand.vmem [shape: bf16[32,64], index: 7, kind: input, shape index: {}]   ;;  %s1923_s8 = inlined_call_operand.vmem [shape: f32[1,64], index: 8, kind: input, shape index: {}]   ;;  %s1924_s9 = inlined_call_operand.vmem [shape: bf16[64,32], index: 9, kind: input, shape index: {}]   ;;  %s1925_s10 = inlined_call_operand.vmem [shape: f32[1,32], index: 10, kind: input, shape index: {}]   ;;  %s1926_s11 = inlined_call_operand.vmem [shape: f32[2,8,32], index: 11, kind: output, shape index: {}]  }
   0x1   :  { %s1725_s19 = smov 0  }
   0x2 LB: > { %s33_s20 = sadd.s32 1, %s1646_s18  ;;  %p1406_p0 = scmp.ge.s32.totalorder %s1650_s19, 1  ;;  %s1650_s19 = sphi %s1725_s19, %s21_s19   ;;  %s1646_s18 = sphi %s1723_s18, %s1928_s18   ;;  %s1642_s17 = sphi %s1721_s17, %s1927_s17  }
   0x3   : > { %p35_p1 = scmp.ge.s32.totalorder %s33_s20, 2  ;;  %p378_p2 = scmp.lt.s32.totalorder %s1650_s19, 3 }
   0x5   : > { %s1930_s20 = smov (%p35_p1, %s33_s20), 0  ;;  %p379_p3 = pnand %p1406_p0, %p378_p2 }
   0x6   : > { %p433_p4 = scmp.lt.s32.totalorder (!%p379_p3), %s1642_s17, 1  ;;  %s1654_s28 = smov (!%p379_p3), 120  }
   0x7   : > { %382 = sbr.rel (%p379_p3) target bundleno = 2775 (0xad7), region = 64  ;;  %s1655_s29 = smov (!%p379_p3), 96  }
   0x8   : > { %s1656_s30 = smov (!%p379_p3), 88   ;;  %s1657_s12 = smov (!%p379_p3), 112  }
   0x9   : > { %s1659_s22 = smov (!%p379_p3), 104   ;;  %s1660_s25 = smov (!%p379_p3), 72  }
   0xc   : > { %v1652_v0 = vmov 0.0   ;;  %vm1653_vm0 = vmmov 0   ;;  %s1932_s17 = smov (!%p433_p4, %s1642_s17), 1  ;;  %vm462_vm1 = vcmask 64512   ;;  %vm527_vm2 = vcmask 1043456  }
   0xd   : > { %1475 = vmatprep.subr.bf16.mxu0 %v1652_v0  ;;  %1477 = vmatprep.mubr.msk.bf16.mxu0 %vm1653_vm0, %v1652_v0  ;;  %s1408_s21 = sshll.u32 %s1932_s17, 2  ;;  %v574_v33 = vld [vmem:[%s1918_s3] sm:$0xf]  ;;  %v1417_v41 = vld [vmem:[%s1918_s3 + $0x4] sm:$0xf]  ;;  %vm1114_vm3 = vcmask 261120  }
   0xe   : > { %1481 = vmatprep.subr.bf16.mxu1 %v1652_v0  ;;  %1483 = vmatprep.mubr.msk.bf16.mxu1 %vm1653_vm0, %v1652_v0  ;;  %s450_s24 = scalar_lea.vmem %s1917_s2, %s1408_s21  ;;  %s446_s27 = scalar_lea.vmem %s1916_s1, %s1408_s21  ;;  %v741_v34 = vsel %vm527_vm2, %v574_v33, 0  ;;  %v695_v42 = vsel %vm527_vm2, %v1417_v41, 0  ;;  %vm1255_vm4 = vcmask 523264  }
   0xf   : > { %v461_v1 = vld [vmem:[%s450_s24] sm:$0xf]  ;;  %s1658_s21 = smov 80  }
  0x10   : > { %v467_v2 = vsel %vm462_vm1, %v461_v1, 0  ;;  %v460_v3 = vld [vmem:[%s446_s27] sm:$0xf]  ;;  %v1759_v4 = vcombine.low %v461_v1, %v461_v1 }
  0x11   : > { %1476 = vmatpush3.bf16.xpose.msra.mxu0 %v467_v2  ;;  %v1762_v5 = vcombine.low %v460_v3, %v460_v3 }
  0x12   : > { %1505 = vmatprep.subr.bf16.mxu0 %v1652_v0  ;;  %580 = vrot.lane.b32.xlu1 %v1759_v4, %s1654_s28 }
  0x16   : > { %578 = vrot.lane.b32.xlu1 %v1762_v5, %s1654_s28  ;;  %s1407_s28 = sshll.u32 %s1932_s17, 3 }
  0x17   : > { %s457_s27 = scalar_lea.vmem %s1926_s11, %s1407_s28 }
  0x18   : > { %1478 = vmatmul.mubr.msk.bf16.vlgmr.msra.gmra.mxu0 %vm462_vm1, %v460_v3 }
  0x19   : > { %1507 = vmatprep.mubr.msk.bf16.mxu0 %vm1653_vm0, %v1652_v0  ;;  %1506 = vmatpush3.bf16.msra.mxu0 %v741_v34 }
  0x1a   : > { %1517 = vmatprep.subr.bf16.mxu0 %v1652_v0 }
  0x84   : > { %v581_v16 = vpop.permute.xlu1 %580 }
  0x85   : > { %v586_v18 = vsel %vm462_vm1, %v581_v16, 0 }
  0x88   : > { %v579_v20 = vpop.permute.xlu1 %578 }
  0xd8   : > { %v503_v6 = vpop.f32.mrf.mxu0 }
  0xd9   : > { %v509_v7 = vsel %vm462_vm1, %v503_v6, -inf }
  0xda   : > { %510 = vmax.xlane.f32.xlu0 %v509_v7  ;;  %v1479_v8 = vpop.f32.mrf.mxu0 }
  0xdc   : > { %v506_v9 = vpop.f32.mrf.mxu0 }
  0xde   : > { %v1480_v10 = vpop.f32.mrf.mxu0 }
  0xf0   : > { %522 = vrot.lane.b32.xlu0 %v1759_v4, %s1655_s29 }
  0xf4   : > { %638 = vrot.lane.b32.xlu0 %v1759_v4, %s1656_s30 }
 0x163   : > { %v511_v11 = vpop.xlane.xlu0 %510 }
 0x164   : > { %v512_v12 = vsub.f32 %v503_v6, %v511_v11 }
 0x166   : > { %v513_v13 = vmul.f32 1.442695, %v512_v12 }
 0x167   : > { %v523_v14 = vpop.permute.xlu0 %522 }
 0x168   : > { %1608 = vpow2.f32 %v513_v13  ;;  %v529_v15 = vsel %vm527_vm2, %v523_v14, 0 }
 0x169   : > { %1482 = vmatpush3.bf16.msra.mxu1 %v529_v15 }
 0x16a   : > { %1487 = vmatprep.subr.bf16.mxu1 %v1652_v0 }
 0x16b   : > { %v639_v30 = vpop.permute.xlu0 %638 }
 0x16c   : > { %v644_v31 = vsel %vm527_vm2, %v639_v30, 0 }
 0x175   : > { %v1609_v17 = vpop.eup %1608 }
 0x176   : > { %v518_v19 = vpack.c.bf16 %v1609_v17, %v1609_v17  ;;  %v515_v32 = vsel %vm462_vm1, %v1609_v17, 0.0 }
 0x178   : > { %1484 = vmatmul.mubr.msk.bf16.vlgmr.msra.gmra.mxu1 %vm462_vm1, %v518_v19 }
 0x179   : > { %1488 = vmatpush3.bf16.xpose.msra.mxu1 %v586_v18  ;;  %1489 = vmatprep.mubr.msk.bf16.mxu1 %vm1653_vm0, %v1652_v0 }
 0x17a   : > { %1493 = vmatprep.subr.bf16.mxu1 %v1652_v0 }
 0x180   : > { %1490 = vmatmul.mubr.msk.bf16.vlgmr.msra.gmra.mxu1 %vm462_vm1, %v579_v20  ;;  %v1422_v20 = vld [vmem:[%s1918_s3 + $0x8] sm:$0xf] }
 0x181   : > { %1495 = vmatprep.mubr.msk.bf16.mxu1 %vm1653_vm0, %v1652_v0  ;;  %1494 = vmatpush3.bf16.msra.mxu1 %v644_v31 }
 0x182   : > { %1499 = vmatprep.subr.bf16.mxu1 %v1652_v0 }
 0x238   : > { %v565_v21 = vpop.f32.mrf.mxu1 }
 0x23a   : > { %v1485_v22 = vpop.f32.mrf.mxu1 }
 0x23c   : > { %v568_v23 = vpop.f32.mrf.mxu1 }
 0x23e   : > { %v1486_v24 = vpop.f32.mrf.mxu1 }
 0x240   : > { %v622_v25 = vpop.f32.mrf.mxu1 }
 0x241   : > { %v628_v26 = vsel %vm462_vm1, %v622_v25, -inf }
 0x242   : > { %629 = vmax.xlane.f32.xlu1 %v628_v26  ;;  %v1491_v27 = vpop.f32.mrf.mxu1 }
 0x244   : > { %v625_v28 = vpop.f32.mrf.mxu1 }
 0x246   : > { %v1492_v29 = vpop.f32.mrf.mxu1 }
 0x253   : > { %785 = vrot.lane.b32.xlu1 %v1759_v4, %s1657_s12 }
 0x277   : > { %516 = vadd.xlane.f32.xlu1 %v515_v32 }
 0x288   : > { %843 = vrot.lane.b32.xlu1 %v1759_v4, %s1658_s21 }
 0x28c   : > { %943 = vrot.lane.b32.xlu1 %v1762_v5, %s1659_s22 }
 0x2cb   : > { %v630_v35 = vpop.xlane.xlu1 %629 }
 0x2cc   : > { %v631_v36 = vsub.f32 %v622_v25, %v630_v35 }
 0x2ce   : > { %v632_v37 = vmul.f32 1.442695, %v631_v36 }
 0x2cf   : > { %v786_v43 = vpop.permute.xlu1 %785 }
 0x2d0   : > { %1610 = vpow2.f32 %v632_v37  ;;  %v791_v53 = vsel %vm462_vm1, %v786_v43, 0 }
 0x2dd   : > { %v1611_v38 = vpop.eup %1610 }
 0x2de   : > { %v634_v39 = vsel %vm462_vm1, %v1611_v38, 0.0  ;;  %v637_v40 = vpack.c.bf16 %v1611_v38, %v1611_v38 }
 0x2df   : > { %635 = vadd.xlane.f32.xlu0 %v634_v39 }
 0x2e0   : > { %1496 = vmatmul.mubr.msk.bf16.vlgmr.msra.gmra.mxu1 %vm462_vm1, %v637_v40 }
 0x2e1   : > { %1501 = vmatprep.mubr.msk.bf16.mxu1 %vm1653_vm0, %v1652_v0  ;;  %1500 = vmatpush3.bf16.msra.mxu1 %v695_v42  ;;  %v1426_v42 = vld [vmem:[%s1918_s3 + $0xc] sm:$0xf] }
 0x2e2   : > { %1511 = vmatprep.subr.bf16.mxu1 %v1652_v0  ;;  %v1060_v43 = vsel %vm527_vm2, %v1426_v42, 0 }
 0x2f5   : > { %783 = vrot.lane.b32.xlu0 %v1762_v5, %s1657_s12  ;;  %s439_s12 = scalar_lea.vmem %s1915_s0, %s1407_s28 }
 0x300   : > { %v517_v44 = vpop.xlane.xlu1 %516 }
 0x301   : > { %1612 = vrcp.f32 %v517_v44 }
 0x304   : > { %v844_v10 = vpop.permute.xlu1 %843 }
 0x305   : > { %v849_v11 = vsel %vm527_vm2, %v844_v10, 0 }
 0x308   : > { %v944_v19 = vpop.permute.xlu1 %943 }
 0x30e   : > { %v1613_v45 = vpop.eup %1612 }
 0x30f   : > { %v572_v46 = vmul.f32 %v1613_v45, %v565_v21  ;;  %v900_v21 = vsel %vm527_vm2, %v1422_v20, 0 }
 0x311   : > { %v573_v47 = vpack.c.bf16 %v572_v46, %v572_v46 }
 0x313   : > { %1508 = vmatmul.mubr.msk.bf16.vlgmr.msra.gmra.mxu0 %vm462_vm1, %v573_v47 }
 0x314   : > { %1519 = vmatprep.mubr.msk.bf16.mxu0 %vm1653_vm0, %v1652_v0  ;;  %1518 = vmatpush3.bf16.msra.mxu0 %v849_v11 }
 0x315   : > { %1529 = vmatprep.subr.bf16.mxu0 %v1652_v0 }
 0x368   : > { %v636_v48 = vpop.xlane.xlu0 %635 }
 0x369   : > { %1614 = vrcp.f32 %v636_v48 }
 0x36c   : > { %v784_v57 = vpop.permute.xlu0 %783 }
 0x376   : > { %v1615_v49 = vpop.eup %1614 }
 0x3a0   : > { %v680_v50 = vpop.f32.mrf.mxu1 }
 0x3a1   : > { %v687_v51 = vmul.f32 %v1615_v49, %v680_v50 }
 0x3a2   : > { %v1497_v52 = vpop.f32.mrf.mxu1 }
 0x3a3   : > { %v688_v54 = vpack.c.bf16 %v687_v51, %v687_v51 }
 0x3a4   : > { %v683_v55 = vpop.f32.mrf.mxu1 }
 0x3a5   : > { %1502 = vmatmul.mubr.msk.bf16.vlgmr.msra.gmra.mxu1 %vm462_vm1, %v688_v54 }
 0x3a6   : > { %1512 = vmatpush3.bf16.xpose.msra.mxu1 %v791_v53  ;;  %v1498_v56 = vpop.f32.mrf.mxu1  ;;  %1513 = vmatprep.mubr.msk.bf16.mxu1 %vm1653_vm0, %v1652_v0 }
 0x3a7   : > { %1523 = vmatprep.subr.bf16.mxu1 %v1652_v0 }
 0x3ad   : > { %1514 = vmatmul.mubr.msk.bf16.vlgmr.msra.gmra.mxu1 %vm462_vm1, %v784_v57 }
 0x3ae   : > { %1525 = vmatprep.mubr.msk.bf16.mxu1 %vm1653_vm0, %v1652_v0  ;;  %1524 = vmatpush3.bf16.msra.mxu1 %v900_v21 }
 0x3af   : > { %1535 = vmatprep.subr.bf16.mxu1 %v1652_v0 }
 0x3d3   : > { %v1809_v58 = vpop.f32.mrf.mxu0 }
 0x3d5   : > { %v1509_v59 = vpop.f32.mrf.mxu0 }
 0x3d7   : > { %v780_v60 = vpop.f32.mrf.mxu0 }
 0x3d9   : > { %v1510_v61 = vpop.f32.mrf.mxu0 }
 0x3da   : > { %v1428_v61 = vld [vmem:[%s1919_s4] ss:$0 sm:$0xff] }
 0x465   : > { %v1813_v62 = vpop.f32.mrf.mxu1 }
 0x466   : > { %v778_v44 = vadd.f32 %v1809_v58, %v1813_v62  ;;  %v459_v58 = vld [vmem:[%s439_s12] sm:$0xff] }
 0x467   : > { %v1503_v63 = vpop.f32.mrf.mxu1 }
 0x469   : > { %v734_v1 = vpop.f32.mrf.mxu1 }
 0x46b   : > { %v1504_v2 = vpop.f32.mrf.mxu1 }
 0x46d   : > { %v827_v3 = vpop.f32.mrf.mxu1 }
 0x46e   : > { %v833_v6 = vsel %vm462_vm1, %v827_v3, -inf }
 0x46f   : > { %834 = vmax.xlane.f32.xlu0 %v833_v6  ;;  %v1515_v7 = vpop.f32.mrf.mxu1 }
 0x471   : > { %v830_v8 = vpop.f32.mrf.mxu1 }
 0x473   : > { %v1516_v9 = vpop.f32.mrf.mxu1 }
 0x485   : > { %945 = vrot.lane.b32.xlu0 %v1759_v4, %s1659_s22 }
 0x4f8   : > { %v835_v5 = vpop.xlane.xlu0 %834 }
 0x4f9   : > { %v836_v12 = vsub.f32 %v827_v3, %v835_v5  ;;  %v1602_v5 = vld [vmem:[%s1922_s7 + $0x8] sm:$0xff]  }
 0x4fb   : > { %v837_v13 = vmul.f32 1.442695, %v836_v12  ;;  %v1603_v12 = vld [vmem:[%s1922_s7] sm:$0xff]  }
 0x4fc   : > { %v946_v14 = vpop.permute.xlu0 %945 }
 0x4fd   : > { %1616 = vpow2.f32 %v837_v13  ;;  %v951_v16 = vsel %vm462_vm1, %v946_v14, 0 }
 0x50a   : > { %v1617_v15 = vpop.eup %1616 }
 0x50b   : > { %v839_v17 = vsel %vm462_vm1, %v1617_v15, 0.0  ;;  %v842_v18 = vpack.c.bf16 %v1617_v15, %v1617_v15 }
 0x50c   : > { %840 = vadd.xlane.f32.xlu1 %v839_v17  ;;  %v1429_v17 = vld [vmem:[%s1920_s5] ss:$0 sm:$0xff] }
 0x50d   : > { %1520 = vmatmul.mubr.msk.bf16.vlgmr.msra.gmra.mxu0 %vm462_vm1, %v842_v18 }
 0x50e   : > { %1530 = vmatpush3.bf16.xpose.msra.mxu0 %v951_v16  ;;  %1531 = vmatprep.mubr.msk.bf16.mxu0 %vm1653_vm0, %v1652_v0 }
 0x50f   : > { %1541 = vmatprep.subr.bf16.mxu0 %v1652_v0 }
 0x515   : > { %1532 = vmatmul.mubr.msk.bf16.vlgmr.msra.gmra.mxu0 %vm462_vm1, %v944_v19  ;;  %v1430_v19 = vld [vmem:[%s1921_s6] ss:$0 sm:$0xff] }
 0x516   : > { %1543 = vmatprep.mubr.msk.bf16.mxu0 %vm1653_vm0, %v1652_v0  ;;  %1542 = vmatpush3.bf16.msra.mxu0 %v1060_v43 }
 0x517   : > { %1555 = vmatprep.subr.bf16.mxu0 %v1652_v0 }
 0x51d   : > { %1003 = vrot.lane.b32.xlu1 %v1759_v4, %s1660_s25 }
 0x595   : > { %v841_v22 = vpop.xlane.xlu1 %840 }
 0x596   : > { %1618 = vrcp.f32 %v841_v22 }
 0x599   : > { %v1004_v34 = vpop.permute.xlu1 %1003 }
 0x59a   : > { %v1009_v35 = vsel %vm527_vm2, %v1004_v34, 0 }
 0x5a3   : > { %v1619_v23 = vpop.eup %1618 }
 0x5cd   : > { %v885_v24 = vpop.f32.mrf.mxu0 }
 0x5ce   : > { %v892_v25 = vmul.f32 %v1619_v23, %v885_v24  ;;  %v1604_v23 = vld [vmem:[%s1924_s9 + $0x18] sm:$0xff]   ;;  %v1605_v24 = vld [vmem:[%s1924_s9 + $0x10] sm:$0xff]  }
 0x5cf   : > { %v1521_v26 = vpop.f32.mrf.mxu0 }
 0x5d0   : > { %v893_v27 = vpack.c.bf16 %v892_v25, %v892_v25  ;;  %v1606_v25 = vld [vmem:[%s1924_s9 + $0x8] sm:$0xff]   ;;  %v1607_v26 = vld [vmem:[%s1924_s9] sm:$0xff]  }
 0x5d1   : > { %v888_v28 = vpop.f32.mrf.mxu0 }
 0x5d2   : > { %1526 = vmatmul.mubr.msk.bf16.vlgmr.msra.gmra.mxu1 %vm462_vm1, %v893_v27  ;;  %v1431_v27 = vld [vmem:[%s1923_s8] ss:$0 sm:$0xff] }
 0x5d3   : > { %v1522_v29 = vpop.f32.mrf.mxu0  ;;  %1537 = vmatprep.mubr.msk.bf16.mxu1 %vm1653_vm0, %v1652_v0  ;;  %1536 = vmatpush3.bf16.msra.mxu1 %v1009_v35 }
 0x5d4   : > { %1547 = vmatprep.subr.bf16.mxu1 %v1652_v0 }
 0x5d5   : > { %v987_v30 = vpop.f32.mrf.mxu0 }
 0x5d6   : > { %v993_v31 = vsel %vm462_vm1, %v987_v30, -inf }
 0x5d7   : > { %994 = vmax.xlane.f32.xlu0 %v993_v31  ;;  %v1533_v32 = vpop.f32.mrf.mxu0 }
 0x5d9   : > { %v990_v4 = vpop.f32.mrf.mxu0 }
 0x5db   : > { %v1534_v33 = vpop.f32.mrf.mxu0 }
 0x660   : > { %v995_v36 = vpop.xlane.xlu0 %994 }
 0x661   : > { %v996_v37 = vsub.f32 %v987_v30, %v995_v36 }
 0x663   : > { %v997_v38 = vmul.f32 1.442695, %v996_v37  ;;  %v1435_v37 = vld [vmem:[%s1925_s10] ss:$0 sm:$0xff] }
 0x665   : > { %1620 = vpow2.f32 %v997_v38 }
 0x672   : > { %v1621_v39 = vpop.eup %1620 }
 0x673   : > { %v999_v40 = vsel %vm462_vm1, %v1621_v39, 0.0  ;;  %v1002_v41 = vpack.c.bf16 %v1621_v39, %v1621_v39 }
 0x674   : > { %1000 = vadd.xlane.f32.xlu0 %v999_v40 }
 0x675   : > { %1538 = vmatmul.mubr.msk.bf16.vlgmr.msra.gmra.mxu1 %vm462_vm1, %v1002_v41 }
 0x676   : > { %1551 = vmatprep.mubr.msk.bf16.mxu1 %vm1653_vm0, %v1652_v0  ;;  %1548 = vmatpush3.bf16.msra.mxu1 %v1602_v5 }
 0x677   : > { %1549 = vmatprep.subr.bf16.mxu1 %v1652_v0 }
 0x67a   : > { %1550 = vmatpush3.bf16.msra.mxu1 %v1603_v12 }
 0x692   : > { %v936_v45 = vpop.f32.mrf.mxu1 }
 0x693   : > { %v942_v46 = vadd.f32 %v936_v45, %v778_v44 }
 0x694   : > { %v1527_v47 = vpop.f32.mrf.mxu1 }
 0x696   : > { %v939_v48 = vpop.f32.mrf.mxu1 }
 0x698   : > { %v1528_v49 = vpop.f32.mrf.mxu1 }
 0x6fd   : > { %v1001_v50 = vpop.xlane.xlu0 %1000 }
 0x6fe   : > { %1622 = vrcp.f32 %v1001_v50 }
 0x70b   : > { %v1623_v51 = vpop.eup %1622 }
 0x735   : > { %v1045_v52 = vpop.f32.mrf.mxu1 }
 0x736   : > { %v1052_v53 = vmul.f32 %v1623_v51, %v1045_v52 }
 0x737   : > { %v1539_v54 = vpop.f32.mrf.mxu1 }
 0x738   : > { %v1053_v55 = vpack.c.bf16 %v1052_v53, %v1052_v53 }
 0x739   : > { %v1048_v56 = vpop.f32.mrf.mxu1 }
 0x73a   : > { %1544 = vmatmul.mubr.msk.bf16.vlgmr.msra.gmra.mxu0 %vm462_vm1, %v1053_v55 }
 0x73b   : > { %v1540_v57 = vpop.f32.mrf.mxu1  ;;  %1563 = vmatprep.mubr.msk.bf16.mxu0 %vm1653_vm0, %v1652_v0  ;;  %1556 = vmatpush3.bf16.msra.mxu0 %v1604_v23 }
 0x73c   : > { %1557 = vmatprep.subr.bf16.mxu0 %v1652_v0 }
 0x73f   : > { %1558 = vmatpush3.bf16.msra.mxu0 %v1605_v24 }
 0x740   : > { %1559 = vmatprep.subr.bf16.mxu0 %v1652_v0 }
 0x743   : > { %1560 = vmatpush3.bf16.msra.mxu0 %v1606_v25 }
 0x744   : > { %1561 = vmatprep.subr.bf16.mxu0 %v1652_v0 }
 0x747   : > { %1562 = vmatpush3.bf16.msra.mxu0 %v1607_v26 }
 0x7fa   : > { %v1096_v59 = vpop.f32.mrf.mxu0 }
 0x7fb   : > { %v1102_v60 = vadd.f32 %v1096_v59, %v942_v46 }
 0x7fc   : > { %v1545_v62 = vpop.f32.mrf.mxu0 }
 0x7fd   : > { %v1103_v63 = vadd.f32 %v1102_v60, %v459_v58 }
 0x7fe   : > { %v1099_v1 = vpop.f32.mrf.mxu0 }
 0x7ff   : > { %v1111_v2 = vadd.f32 %v1428_v61, %v1103_v63 }
 0x800   : > { %v1546_v3 = vpop.f32.mrf.mxu0 }
 0x801   : > { %v1115_v6 = vsel %vm1114_vm3, %v1111_v2, 0.0 }
 0x802   : > { %1116 = vadd.xlane.f32.xlu0 %v1115_v6 }
 0x88b   : > { %v1117_v7 = vpop.xlane.xlu0 %1116 }
 0x88c   : > { %v1119_v8 = vmul.f32 0.03125, %v1117_v7 }
 0x88e   : > { %v1120_v9 = vsub.f32 %v1111_v2, %v1119_v8 }
 0x890   : > { %v1121_v10 = vmul.f32 %v1120_v9, %v1120_v9 }
 0x892   : > { %v1122_v11 = vsel %vm1114_vm3, %v1121_v10, 0.0 }
 0x893   : > { %1123 = vadd.xlane.f32.xlu1 %v1122_v11 }
 0x91c   : > { %v1124_v13 = vpop.xlane.xlu1 %1123 }
 0x91d   : > { %v1125_v14 = vmul.f32 0.03125, %v1124_v13 }
 0x91f   : > { %v1126_v15 = vadd.f32 1e-05, %v1125_v14 }
 0x921   : > { %1624 = vrsqrt.f32 %v1126_v15 }
 0x92e   : > { %v1625_v16 = vpop.eup %1624 }
 0x92f   : > { %v1128_v18 = vmul.f32 %v1625_v16, %v1120_v9 }
 0x931   : > { %v1135_v20 = vmul.f32 %v1429_v17, %v1128_v18 }
 0x933   : > { %v1142_v21 = vadd.f32 %v1430_v19, %v1135_v20 }
 0x935   : > { %v1143_v22 = vpack.c.bf16 %v1142_v21, %v1142_v21 }
 0x937   : > { %1552 = vmatmul.mubr.msk.bf16.vlgmr.msra.gmra.mxu1 %vm1114_vm3, %v1143_v22 }
 0x9f7   : > { %v1204_v28 = vpop.f32.mrf.mxu1 }
 0x9f8   : > { %v1205_v29 = vadd.f32 %v1431_v27, %v1204_v28 }
 0x9f9   : > { %v1553_v30 = vpop.f32.mrf.mxu1 }
 0x9fa   : > { %v1211_v31 = vmul.f32 0.70710677, %v1205_v29  ;;  %v1210_v34 = vmul.f32 0.5, %v1205_v29 }
 0x9fb   : > { %v1207_v32 = vpop.f32.mrf.mxu1 }
 0x9fc   : > { %1626 = verf.f32 %v1211_v31 }
 0x9fd   : > { %v1554_v4 = vpop.f32.mrf.mxu1 }
 0xa09   : > { %v1627_v33 = vpop.eup %1626 }
 0xa0a   : > { %v1213_v0 = vadd.f32 1.0, %v1627_v33 }
 0xa0c   : > { %v1214_v35 = vmul.f32 %v1213_v0, %v1210_v34 }
 0xa0e   : > { %v1215_v36 = vpack.c.bf16 %v1214_v35, %v1214_v35 }
 0xa10   : > { %1564 = vmatmul.mubr.msk.bf16.vlgmr.msra.gmra.mxu0 %vm1255_vm4, %v1215_v36 }
 0xad0   : > { %v1293_v38 = vpop.f32.mrf.mxu0 }
 0xad1   : > { %v1294_v39 = vadd.f32 %v1435_v37, %v1293_v38 }
 0xad2   : > { %v1565_v40 = vpop.f32.mrf.mxu0 }
 0xad3   : > { %v1299_v41 = vadd.f32 %v1294_v39, %v1111_v2 }
 0xad4   : > { %v1296_v42 = vpop.f32.mrf.mxu0 }
 0xad5   : > { %1300 = vst.msk [vmem:[%s457_s27] sm:$0xff] %vm1114_vm3, %v1299_v41 }
 0xad6   : > { %v1566_v43 = vpop.f32.mrf.mxu0 }
 0xad7 PF: > { %s21_s19 = sadd.s32 1, %s1650_s19   ;;  %s1927_s17 = smov %s1646_s18 }
 0xad8   : > { %p18_p5 = scmp.ge.s32.totalorder %s21_s19, 4   ;;  %s1928_s18 = smov %s1930_s20 }
 0xada   :  { %20 = sbr.rel (!%p18_p5) target bundleno = 2 (0x2), region = 103 }

// kernel: transformer_forward.7
= control target key start
LH: loop header
LB: loop body
LE: loop exit
PB: predicated region body
PF: predicated region fallthrough
CT: control target
= control target key end

     0   :  { %s2083_s0 = inlined_call_operand.vmem [shape: f32[2,8,32], index: 0, kind: input, shape index: {}]   ;;  %s2084_s1 = inlined_call_operand.vmem [shape: bf16[2,8,32], index: 1, kind: input, shape index: {}]   ;;  %s2085_s2 = inlined_call_operand.vmem [shape: bf16[2,8,64], index: 2, kind: input, shape index: {}]   ;;  %s2086_s3 = inlined_call_operand.vmem [shape: bf16[4,8,32], index: 3, kind: input, shape index: {}]   ;;  %s2087_s4 = inlined_call_operand.vmem [shape: f32[1,32], index: 4, kind: input, shape index: {}]   ;;  %s2088_s5 = inlined_call_operand.vmem [shape: f32[1,32], index: 5, kind: input, shape index: {}]   ;;  %s2089_s6 = inlined_call_operand.vmem [shape: f32[1,32], index: 6, kind: input, shape index: {}]   ;;  %s2090_s7 = inlined_call_operand.vmem [shape: bf16[32,64], index: 7, kind: input, shape index: {}]   ;;  %s2091_s8 = inlined_call_operand.vmem [shape: f32[1,64], index: 8, kind: input, shape index: {}]   ;;  %s2092_s9 = inlined_call_operand.vmem [shape: bf16[64,32], index: 9, kind: input, shape index: {}]   ;;  %s2093_s10 = inlined_call_operand.vmem [shape: f32[1,32], index: 10, kind: input, shape index: {}]   ;;  %s2094_s11 = inlined_call_operand.hbm [shape: f32[2,8,32], index: 11, kind: output, shape index: {}]  }
   0x1   :  { %2095 = sst [smem:[#allocation5_spill]] %s2083_s0 }
   0x2   :  { %2096 = sst [smem:[#allocation6_spill]] %s2084_s1 }
   0x3   :  { %16 = vsyncpa [#allocation3], 0 }
   0x4   :  { %18 = vsyncpa [#allocation3 + $0x1], 0  ;;  %s1815_s17 = smov 0   ;;  %s1817_s18 = smov 0  }
   0x5   :  { %s1819_s19 = smov 0   ;;  %s1821_s20 = smov 0  }
   0x6   :  { %s1823_s21 = smov 0   ;;  %s1825_s22 = smov 0  }
   0x7 LB: > { %s1408_s23 = sadd.s32 4294967295, %s1743_s22   ;;  %s1409_s24 = sadd.s32 4294967294, %s1743_s22   ;;  %s1743_s22 = sphi %s1825_s22, %s24_s22   ;;  %s1739_s21 = sphi %s1823_s21, %s2105_s21   ;;  %s1735_s20 = sphi %s1821_s20, %s2104_s20   ;;  %s1731_s19 = sphi %s1819_s19, %s2103_s19   ;;  %s1727_s18 = sphi %s1817_s18, %s2102_s18   ;;  %s1723_s17 = sphi %s1815_s17, %s2101_s17  }
   0x8   : > { %s36_s25 = sadd.s32 1, %s1739_s21  ;;  %s295_s26 = sadd.s32 1, %s1731_s19 }
   0x9   : > { %p38_p0 = scmp.ge.s32.totalorder %s36_s25, 2  ;;  %p305_p1 = scmp.ne.s32.totalorder %s1731_s19, %s1727_s18 }
   0xa   : > { %p306_p2 = scmp.eq.s32.totalorder %s1408_s23, 1  ;;  %p311_p3 = scmp.ne.s32.totalorder %s1727_s18, %s1723_s17 }
   0xb   : > { %s2107_s25 = smov (%p38_p0, %s36_s25), 0  ;;  %p312_p5 = scmp.eq.s32.totalorder %s1409_s24, 1 }
   0xc   : > { %p1855_p4 = por %p306_p2, %p305_p1  ;;  %s290_s28 = ssub.s32 %s1739_s21, %s2107_s25 }
   0xd   : > { %p1412_p6 = scmp.ge.s32.totalorder %s1743_s22, 1  ;;  %p293_p7 = scmp.eq.s32.totalorder %s290_s28, 0 }
   0xe   : > { %p1862_p8 = por %p312_p5, %p311_p3  ;;  %p381_p9 = scmp.lt.s32.totalorder %s1743_s22, 3 }
   0xf   : > { %s1868_s30 = scalar_select %p293_p7, %s1731_s19, %s295_s26  }
  0x10   : > { %p382_p10 = pnand %p1412_p6, %p381_p9 }
  0x11   : > { %p434_p11 = scmp.lt.s32.totalorder (!%p382_p10), %s1735_s20, 1  ;;  %s2099_s1 = sld [smem:[#allocation6_spill]] (!%p382_p10) }
  0x12   : > { %385 = sbr.rel (%p382_p10) target bundleno = 2799 (0xaef), region = 64  ;;  %s1747_s28 = smov (!%p382_p10), 120  }
  0x13   : > { %s1749_s14 = smov (!%p382_p10), 88   ;;  %s1750_s15 = smov (!%p382_p10), 112  }
  0x14   : > { %s2100_s0 = sld [smem:[#allocation5_spill]] (!%p382_p10)  ;;  %s1754_s24 = smov (!%p382_p10), [#allocation2]  }
  0x17   : > { %v1745_v0 = vmov 0.0   ;;  %vm1746_vm0 = vmmov 0   ;;  %s1875_s12 = scalar_select %p434_p11, %s1735_s20, 1  ;;  %vm456_vm1 = vcmask 64512   ;;  %vm521_vm2 = vcmask 1043456  }
  0x18   : > { %1483 = vmatprep.subr.bf16.mxu0 %v1745_v0  ;;  %1485 = vmatprep.mubr.msk.bf16.mxu0 %vm1746_vm0, %v1745_v0  ;;  %v568_v33 = vld [vmem:[%s2086_s3] sm:$0xf]  ;;  %v1423_v41 = vld [vmem:[%s2086_s3 + $0x4] sm:$0xf]  ;;  %vm1108_vm3 = vcmask 261120   ;;  %vm1249_vm4 = vcmask 523264  }
  0x19   : > { %1489 = vmatprep.subr.bf16.mxu1 %v1745_v0  ;;  %1491 = vmatprep.mubr.msk.bf16.mxu1 %vm1746_vm0, %v1745_v0  ;;  %s1415_s13 = sshll.u32 %s1875_s12, 2  ;;  %v735_v34 = vsel %vm521_vm2, %v568_v33, 0  ;;  %v689_v42 = vsel %vm521_vm2, %v1423_v41, 0 }
  0x1a   : > { %s451_s16 = scalar_lea.vmem %s2085_s2, %s1415_s13  ;;  %s447_s26 = scalar_lea.vmem %s2099_s1, %s1415_s13 }
  0x1b   : > { %v455_v1 = vld [vmem:[%s451_s16] sm:$0xf]  ;;  %s1748_s13 = smov 96   ;;  %s1753_s16 = smov 72  }
  0x1c   : > { %v461_v2 = vsel %vm456_vm1, %v455_v1, 0  ;;  %v454_v3 = vld [vmem:[%s447_s26] sm:$0xf]  ;;  %v1892_v4 = vcombine.low %v455_v1, %v455_v1  ;;  %s1414_s26 = sshll.u32 %s1875_s12, 3  ;;  %s431_s12 = sand.u32 1, %s1727_s18  }
  0x1d   : > { %1484 = vmatpush3.bf16.xpose.msra.mxu0 %v461_v2  ;;  %v1895_v5 = vcombine.low %v454_v3, %v454_v3  ;;  %s1413_s23 = sshll.u32 %s431_s12, 3 }
  0x1e   : > { %1513 = vmatprep.subr.bf16.mxu0 %v1745_v0  ;;  %574 = vrot.lane.b32.xlu1 %v1892_v4, %s1747_s28 }
  0x22   : > { %572 = vrot.lane.b32.xlu1 %v1895_v5, %s1747_s28  ;;  %s1751_s28 = smov 80  }
  0x24   : > { %1486 = vmatmul.mubr.msk.bf16.vlgmr.msra.gmra.mxu0 %vm456_vm1, %v454_v3 }
  0x25   : > { %1515 = vmatprep.mubr.msk.bf16.mxu0 %vm1746_vm0, %v1745_v0  ;;  %1514 = vmatpush3.bf16.msra.mxu0 %v735_v34 }
  0x26   : > { %1525 = vmatprep.subr.bf16.mxu0 %v1745_v0 }
  0x90   : > { %v575_v16 = vpop.permute.xlu1 %574 }
  0x91   : > { %v580_v18 = vsel %vm456_vm1, %v575_v16, 0 }
  0x94   : > { %v573_v20 = vpop.permute.xlu1 %572 }
  0xe4   : > { %v497_v6 = vpop.f32.mrf.mxu0 }
  0xe5   : > { %v503_v7 = vsel %vm456_vm1, %v497_v6, -inf }
  0xe6   : > { %504 = vmax.xlane.f32.xlu0 %v503_v7  ;;  %v1487_v8 = vpop.f32.mrf.mxu0 }
  0xe8   : > { %v500_v9 = vpop.f32.mrf.mxu0 }
  0xea   : > { %v1488_v10 = vpop.f32.mrf.mxu0 }
  0xfc   : > { %516 = vrot.lane.b32.xlu0 %v1892_v4, %s1748_s13  ;;  %s1752_s13 = smov 104  }
 0x100   : > { %632 = vrot.lane.b32.xlu0 %v1892_v4, %s1749_s14  ;;  %s440_s14 = scalar_lea.vmem %s2100_s0, %s1414_s26  ;;  %s1671_s26 = sshll.u32 %s1754_s24, 4  ;;  %s1672_s26 = int_to_ptr.vmem [resolvable:$false] %s1671_s26 }
 0x16f   : > { %v505_v11 = vpop.xlane.xlu0 %504 }
 0x170   : > { %v506_v12 = vsub.f32 %v497_v6, %v505_v11 }
 0x172   : > { %v507_v13 = vmul.f32 1.442695, %v506_v12 }
 0x173   : > { %v517_v14 = vpop.permute.xlu0 %516 }
 0x174   : > { %1647 = vpow2.f32 %v507_v13  ;;  %v523_v15 = vsel %vm521_vm2, %v517_v14, 0 }
 0x175   : > { %1490 = vmatpush3.bf16.msra.mxu1 %v523_v15 }
 0x176   : > { %1495 = vmatprep.subr.bf16.mxu1 %v1745_v0 }
 0x177   : > { %v633_v30 = vpop.permute.xlu0 %632 }
 0x178   : > { %v638_v31 = vsel %vm521_vm2, %v633_v30, 0 }
 0x181   : > { %v1648_v17 = vpop.eup %1647 }
 0x182   : > { %v512_v19 = vpack.c.bf16 %v1648_v17, %v1648_v17  ;;  %v509_v32 = vsel %vm456_vm1, %v1648_v17, 0.0 }
 0x184   : > { %1492 = vmatmul.mubr.msk.bf16.vlgmr.msra.gmra.mxu1 %vm456_vm1, %v512_v19 }
 0x185   : > { %1496 = vmatpush3.bf16.xpose.msra.mxu1 %v580_v18  ;;  %1497 = vmatprep.mubr.msk.bf16.mxu1 %vm1746_vm0, %v1745_v0 }
 0x186   : > { %1501 = vmatprep.subr.bf16.mxu1 %v1745_v0 }
 0x18c   : > { %1498 = vmatmul.mubr.msk.bf16.vlgmr.msra.gmra.mxu1 %vm456_vm1, %v573_v20  ;;  %v1428_v20 = vld [vmem:[%s2086_s3 + $0x8] sm:$0xf] }
 0x18d   : > { %1503 = vmatprep.mubr.msk.bf16.mxu1 %vm1746_vm0, %v1745_v0  ;;  %1502 = vmatpush3.bf16.msra.mxu1 %v638_v31 }
 0x18e   : > { %1507 = vmatprep.subr.bf16.mxu1 %v1745_v0 }
 0x244   : > { %v559_v21 = vpop.f32.mrf.mxu1 }
 0x246   : > { %v1493_v22 = vpop.f32.mrf.mxu1 }
 0x248   : > { %v562_v23 = vpop.f32.mrf.mxu1 }
 0x24a   : > { %v1494_v24 = vpop.f32.mrf.mxu1 }
 0x24c   : > { %v616_v25 = vpop.f32.mrf.mxu1 }
 0x24d   : > { %v622_v26 = vsel %vm456_vm1, %v616_v25, -inf }
 0x24e   : > { %623 = vmax.xlane.f32.xlu1 %v622_v26  ;;  %v1499_v27 = vpop.f32.mrf.mxu1 }
 0x250   : > { %v619_v28 = vpop.f32.mrf.mxu1 }
 0x252   : > { %v1500_v29 = vpop.f32.mrf.mxu1 }
 0x25f   : > { %779 = vrot.lane.b32.xlu1 %v1892_v4, %s1750_s15 }
 0x283   : > { %510 = vadd.xlane.f32.xlu1 %v509_v32 }
 0x294   : > { %837 = vrot.lane.b32.xlu1 %v1892_v4, %s1751_s28  ;;  %s1448_s28 = sshll.u32 %s1735_s20, 7  ;;  %s1296_s20 = scalar_lea.sflag [#allocation3], %s431_s12 }
 0x295   : > { %s2036_s0 = scalar_lea.hbm %s2094_s11, %s1448_s28  ;;  %s1673_s28 = scalar_lea.vmem %s1672_s26, 256 }
 0x298   : > { %937 = vrot.lane.b32.xlu1 %v1895_v5, %s1752_s13 }
 0x2d7   : > { %v624_v35 = vpop.xlane.xlu1 %623 }
 0x2d8   : > { %v625_v36 = vsub.f32 %v616_v25, %v624_v35 }
 0x2da   : > { %v626_v37 = vmul.f32 1.442695, %v625_v36 }
 0x2db   : > { %v780_v43 = vpop.permute.xlu1 %779 }
 0x2dc   : > { %1649 = vpow2.f32 %v626_v37  ;;  %v785_v53 = vsel %vm456_vm1, %v780_v43, 0 }
 0x2e9   : > { %v1650_v38 = vpop.eup %1649 }
 0x2ea   : > { %v628_v39 = vsel %vm456_vm1, %v1650_v38, 0.0  ;;  %v631_v40 = vpack.c.bf16 %v1650_v38, %v1650_v38 }
 0x2eb   : > { %629 = vadd.xlane.f32.xlu0 %v628_v39 }
 0x2ec   : > { %1504 = vmatmul.mubr.msk.bf16.vlgmr.msra.gmra.mxu1 %vm456_vm1, %v631_v40 }
 0x2ed   : > { %1509 = vmatprep.mubr.msk.bf16.mxu1 %vm1746_vm0, %v1745_v0  ;;  %1508 = vmatpush3.bf16.msra.mxu1 %v689_v42  ;;  %v1432_v42 = vld [vmem:[%s2086_s3 + $0xc] sm:$0xf] }
 0x2ee   : > { %1519 = vmatprep.subr.bf16.mxu1 %v1745_v0  ;;  %v1054_v43 = vsel %vm521_vm2, %v1432_v42, 0 }
 0x301   : > { %777 = vrot.lane.b32.xlu0 %v1895_v5, %s1750_s15 }
 0x30c   : > { %v511_v44 = vpop.xlane.xlu1 %510 }
 0x30d   : > { %1651 = vrcp.f32 %v511_v44 }
 0x310   : > { %v838_v10 = vpop.permute.xlu1 %837 }
 0x311   : > { %v843_v11 = vsel %vm521_vm2, %v838_v10, 0 }
 0x314   : > { %v938_v19 = vpop.permute.xlu1 %937 }
 0x31a   : > { %v1652_v45 = vpop.eup %1651 }
 0x31b   : > { %v566_v46 = vmul.f32 %v1652_v45, %v559_v21  ;;  %v894_v21 = vsel %vm521_vm2, %v1428_v20, 0 }
 0x31d   : > { %v567_v47 = vpack.c.bf16 %v566_v46, %v566_v46 }
 0x31f   : > { %1516 = vmatmul.mubr.msk.bf16.vlgmr.msra.gmra.mxu0 %vm456_vm1, %v567_v47 }
 0x320   : > { %1527 = vmatprep.mubr.msk.bf16.mxu0 %vm1746_vm0, %v1745_v0  ;;  %1526 = vmatpush3.bf16.msra.mxu0 %v843_v11 }
 0x321   : > { %1537 = vmatprep.subr.bf16.mxu0 %v1745_v0 }
 0x374   : > { %v630_v48 = vpop.xlane.xlu0 %629 }
 0x375   : > { %1653 = vrcp.f32 %v630_v48 }
 0x378   : > { %v778_v57 = vpop.permute.xlu0 %777 }
 0x382   : > { %v1654_v49 = vpop.eup %1653 }
 0x3ac   : > { %v674_v50 = vpop.f32.mrf.mxu1 }
 0x3ad   : > { %v681_v51 = vmul.f32 %v1654_v49, %v674_v50 }
 0x3ae   : > { %v1505_v52 = vpop.f32.mrf.mxu1 }
 0x3af   : > { %v682_v54 = vpack.c.bf16 %v681_v51, %v681_v51 }
 0x3b0   : > { %v677_v55 = vpop.f32.mrf.mxu1 }
 0x3b1   : > { %1510 = vmatmul.mubr.msk.bf16.vlgmr.msra.gmra.mxu1 %vm456_vm1, %v682_v54 }
 0x3b2   : > { %1520 = vmatpush3.bf16.xpose.msra.mxu1 %v785_v53  ;;  %v1506_v56 = vpop.f32.mrf.mxu1  ;;  %1521 = vmatprep.mubr.msk.bf16.mxu1 %vm1746_vm0, %v1745_v0 }
 0x3b3   : > { %1531 = vmatprep.subr.bf16.mxu1 %v1745_v0 }
 0x3b9   : > { %1522 = vmatmul.mubr.msk.bf16.vlgmr.msra.gmra.mxu1 %vm456_vm1, %v778_v57 }
 0x3ba   : > { %1533 = vmatprep.mubr.msk.bf16.mxu1 %vm1746_vm0, %v1745_v0  ;;  %1532 = vmatpush3.bf16.msra.mxu1 %v894_v21 }
 0x3bb   : > { %1543 = vmatprep.subr.bf16.mxu1 %v1745_v0 }
 0x3df   : > { %v1942_v58 = vpop.f32.mrf.mxu0 }
 0x3e1   : > { %v1517_v59 = vpop.f32.mrf.mxu0 }
 0x3e3   : > { %v774_v60 = vpop.f32.mrf.mxu0 }
 0x3e5   : > { %v1518_v61 = vpop.f32.mrf.mxu0 }
 0x3e6   : > { %v1434_v61 = vld [vmem:[%s2087_s4] ss:$0 sm:$0xff] }
 0x471   : > { %v1946_v62 = vpop.f32.mrf.mxu1 }
 0x472   : > { %v772_v44 = vadd.f32 %v1942_v58, %v1946_v62  ;;  %v453_v58 = vld [vmem:[%s440_s14] sm:$0xff] }
 0x473   : > { %v1511_v63 = vpop.f32.mrf.mxu1 }
 0x475   : > { %v728_v1 = vpop.f32.mrf.mxu1 }
 0x477   : > { %v1512_v2 = vpop.f32.mrf.mxu1 }
 0x479   : > { %v821_v3 = vpop.f32.mrf.mxu1 }
 0x47a   : > { %v827_v6 = vsel %vm456_vm1, %v821_v3, -inf }
 0x47b   : > { %828 = vmax.xlane.f32.xlu0 %v827_v6  ;;  %v1523_v7 = vpop.f32.mrf.mxu1 }
 0x47d   : > { %v824_v8 = vpop.f32.mrf.mxu1 }
 0x47f   : > { %v1524_v9 = vpop.f32.mrf.mxu1 }
 0x491   : > { %939 = vrot.lane.b32.xlu0 %v1892_v4, %s1752_s13  ;;  %s433_s13 = scalar_lea.vmem [#allocation2], %s1413_s23 }
 0x492   : > { %s1310_s14 = sshll.u32 %s433_s13, 4  ;;  %s2038_s14 = int_to_ptr.vmem [resolvable:$true] %s1310_s14 }
 0x493   : > { %s1667_s23 = scalar_lea.vmem %s2038_s14, 128  ;;  %p1674_p1 = scmp.lt.s32.totalorder %s2038_s14, %s1672_s26 }
 0x494   : > { %p1668_p12 = scmp.ne.s32.totalorder %s2038_s14, %s1667_s23  ;;  %p1675_p2 = scmp.lt.s32.totalorder %s1673_s28, %s1667_s23 }
 0x496   : > { %p1669_p13 = pnand %p1668_p12, %p1855_p4  ;;  %p1676_p3 = por %p1675_p2, %p1674_p1 }
 0x498   : > { %p1670_p0 = pneg %p1669_p13 }
 0x49a   : > { %p1677_p5 = pnand %p1676_p3, %p1670_p0 }
 0x504   : > { %v829_v5 = vpop.xlane.xlu0 %828 }
 0x505   : > { %v830_v12 = vsub.f32 %v821_v3, %v829_v5  ;;  %v1641_v5 = vld [vmem:[%s2090_s7 + $0x8] sm:$0xff]  }
 0x507   : > { %v831_v13 = vmul.f32 1.442695, %v830_v12  ;;  %v1642_v12 = vld [vmem:[%s2090_s7] sm:$0xff]  }
 0x508   : > { %v940_v14 = vpop.permute.xlu0 %939 }
 0x509   : > { %1655 = vpow2.f32 %v831_v13  ;;  %v945_v16 = vsel %vm456_vm1, %v940_v14, 0 }
 0x516   : > { %v1656_v15 = vpop.eup %1655 }
 0x517   : > { %v833_v17 = vsel %vm456_vm1, %v1656_v15, 0.0  ;;  %v836_v18 = vpack.c.bf16 %v1656_v15, %v1656_v15 }
 0x518   : > { %834 = vadd.xlane.f32.xlu1 %v833_v17  ;;  %v1435_v17 = vld [vmem:[%s2088_s5] ss:$0 sm:$0xff] }
 0x519   : > { %1528 = vmatmul.mubr.msk.bf16.vlgmr.msra.gmra.mxu0 %vm456_vm1, %v836_v18 }
 0x51a   : > { %1538 = vmatpush3.bf16.xpose.msra.mxu0 %v945_v16  ;;  %1539 = vmatprep.mubr.msk.bf16.mxu0 %vm1746_vm0, %v1745_v0 }
 0x51b   : > { %1549 = vmatprep.subr.bf16.mxu0 %v1745_v0 }
 0x521   : > { %1540 = vmatmul.mubr.msk.bf16.vlgmr.msra.gmra.mxu0 %vm456_vm1, %v938_v19  ;;  %v1436_v19 = vld [vmem:[%s2089_s6] ss:$0 sm:$0xff] }
 0x522   : > { %1551 = vmatprep.mubr.msk.bf16.mxu0 %vm1746_vm0, %v1745_v0  ;;  %1550 = vmatpush3.bf16.msra.mxu0 %v1054_v43 }
 0x523   : > { %1563 = vmatprep.subr.bf16.mxu0 %v1745_v0 }
 0x529   : > { %997 = vrot.lane.b32.xlu1 %v1892_v4, %s1753_s16 }
 0x5a1   : > { %v835_v22 = vpop.xlane.xlu1 %834 }
 0x5a2   : > { %1657 = vrcp.f32 %v835_v22 }
 0x5a5   : > { %v998_v34 = vpop.permute.xlu1 %997 }
 0x5a6   : > { %v1003_v35 = vsel %vm521_vm2, %v998_v34, 0 }
 0x5af   : > { %v1658_v23 = vpop.eup %1657 }
 0x5d9   : > { %v879_v24 = vpop.f32.mrf.mxu0 }
 0x5da   : > { %v886_v25 = vmul.f32 %v1658_v23, %v879_v24  ;;  %v1643_v23 = vld [vmem:[%s2092_s9 + $0x18] sm:$0xff]   ;;  %v1644_v24 = vld [vmem:[%s2092_s9 + $0x10] sm:$0xff]  }
 0x5db   : > { %v1529_v26 = vpop.f32.mrf.mxu0 }
 0x5dc   : > { %v887_v27 = vpack.c.bf16 %v886_v25, %v886_v25  ;;  %v1645_v25 = vld [vmem:[%s2092_s9 + $0x8] sm:$0xff]   ;;  %v1646_v26 = vld [vmem:[%s2092_s9] sm:$0xff]  }
 0x5dd   : > { %v882_v28 = vpop.f32.mrf.mxu0 }
 0x5de   : > { %1534 = vmatmul.mubr.msk.bf16.vlgmr.msra.gmra.mxu1 %vm456_vm1, %v887_v27  ;;  %v1437_v27 = vld [vmem:[%s2091_s8] ss:$0 sm:$0xff] }
 0x5df   : > { %v1530_v29 = vpop.f32.mrf.mxu0  ;;  %1545 = vmatprep.mubr.msk.bf16.mxu1 %vm1746_vm0, %v1745_v0  ;;  %1544 = vmatpush3.bf16.msra.mxu1 %v1003_v35 }
 0x5e0   : > { %1555 = vmatprep.subr.bf16.mxu1 %v1745_v0 }
 0x5e1   : > { %v981_v30 = vpop.f32.mrf.mxu0 }
 0x5e2   : > { %v987_v31 = vsel %vm456_vm1, %v981_v30, -inf }
 0x5e3   : > { %988 = vmax.xlane.f32.xlu0 %v987_v31  ;;  %v1541_v32 = vpop.f32.mrf.mxu0 }
 0x5e5   : > { %v984_v4 = vpop.f32.mrf.mxu0 }
 0x5e7   : > { %v1542_v33 = vpop.f32.mrf.mxu0 }
 0x66c   : > { %v989_v36 = vpop.xlane.xlu0 %988 }
 0x66d   : > { %v990_v37 = vsub.f32 %v981_v30, %v989_v36 }
 0x66f   : > { %v991_v38 = vmul.f32 1.442695, %v990_v37  ;;  %v1441_v37 = vld [vmem:[%s2093_s10] ss:$0 sm:$0xff] }
 0x671   : > { %1659 = vpow2.f32 %v991_v38 }
 0x67e   : > { %v1660_v39 = vpop.eup %1659 }
 0x67f   : > { %v993_v40 = vsel %vm456_vm1, %v1660_v39, 0.0  ;;  %v996_v41 = vpack.c.bf16 %v1660_v39, %v1660_v39 }
 0x680   : > { %994 = vadd.xlane.f32.xlu0 %v993_v40 }
 0x681   : > { %1546 = vmatmul.mubr.msk.bf16.vlgmr.msra.gmra.mxu1 %vm456_vm1, %v996_v41 }
 0x682   : > { %1559 = vmatprep.mubr.msk.bf16.mxu1 %vm1746_vm0, %v1745_v0  ;;  %1556 = vmatpush3.bf16.msra.mxu1 %v1641_v5 }
 0x683   : > { %1557 = vmatprep.subr.bf16.mxu1 %v1745_v0 }
 0x686   : > { %1558 = vmatpush3.bf16.msra.mxu1 %v1642_v12 }
 0x69e   : > { %v930_v45 = vpop.f32.mrf.mxu1 }
 0x69f   : > { %v936_v46 = vadd.f32 %v930_v45, %v772_v44 }
 0x6a0   : > { %v1535_v47 = vpop.f32.mrf.mxu1 }
 0x6a2   : > { %v933_v48 = vpop.f32.mrf.mxu1 }
 0x6a4   : > { %v1536_v49 = vpop.f32.mrf.mxu1 }
 0x709   : > { %v995_v50 = vpop.xlane.xlu0 %994 }
 0x70a   : > { %1661 = vrcp.f32 %v995_v50 }
 0x717   : > { %v1662_v51 = vpop.eup %1661 }
 0x741   : > { %v1039_v52 = vpop.f32.mrf.mxu1 }
 0x742   : > { %v1046_v53 = vmul.f32 %v1662_v51, %v1039_v52 }
 0x743   : > { %v1547_v54 = vpop.f32.mrf.mxu1 }
 0x744   : > { %v1047_v55 = vpack.c.bf16 %v1046_v53, %v1046_v53 }
 0x745   : > { %v1042_v56 = vpop.f32.mrf.mxu1 }
 0x746   : > { %1552 = vmatmul.mubr.msk.bf16.vlgmr.msra.gmra.mxu0 %vm456_vm1, %v1047_v55 }
 0x747   : > { %v1548_v57 = vpop.f32.mrf.mxu1  ;;  %1571 = vmatprep.mubr.msk.bf16.mxu0 %vm1746_vm0, %v1745_v0  ;;  %1564 = vmatpush3.bf16.msra.mxu0 %v1643_v23 }
 0x748   : > { %1565 = vmatprep.subr.bf16.mxu0 %v1745_v0 }
 0x74b   : > { %1566 = vmatpush3.bf16.msra.mxu0 %v1644_v24 }
 0x74c   : > { %1567 = vmatprep.subr.bf16.mxu0 %v1745_v0 }
 0x74f   : > { %1568 = vmatpush3.bf16.msra.mxu0 %v1645_v25 }
 0x750   : > { %1569 = vmatprep.subr.bf16.mxu0 %v1745_v0 }
 0x753   : > { %1570 = vmatpush3.bf16.msra.mxu0 %v1646_v26 }
 0x806   : > { %v1090_v59 = vpop.f32.mrf.mxu0 }
 0x807   : > { %v1096_v60 = vadd.f32 %v1090_v59, %v936_v46 }
 0x808   : > { %v1553_v62 = vpop.f32.mrf.mxu0 }
 0x809   : > { %v1097_v63 = vadd.f32 %v1096_v60, %v453_v58 }
 0x80a   : > { %v1093_v1 = vpop.f32.mrf.mxu0 }
 0x80b   : > { %v1105_v2 = vadd.f32 %v1434_v61, %v1097_v63 }
 0x80c   : > { %v1554_v3 = vpop.f32.mrf.mxu0 }
 0x80d   : > { %v1109_v6 = vsel %vm1108_vm3, %v1105_v2, 0.0 }
 0x80e   : > { %1110 = vadd.xlane.f32.xlu0 %v1109_v6 }
 0x897   : > { %v1111_v7 = vpop.xlane.xlu0 %1110 }
 0x898   : > { %v1113_v8 = vmul.f32 0.03125, %v1111_v7 }
 0x89a   : > { %v1114_v9 = vsub.f32 %v1105_v2, %v1113_v8 }
 0x89c   : > { %v1115_v10 = vmul.f32 %v1114_v9, %v1114_v9 }
 0x89e   : > { %v1116_v11 = vsel %vm1108_vm3, %v1115_v10, 0.0 }
 0x89f   : > { %1117 = vadd.xlane.f32.xlu1 %v1116_v11 }
 0x928   : > { %v1118_v13 = vpop.xlane.xlu1 %1117 }
 0x929   : > { %v1119_v14 = vmul.f32 0.03125, %v1118_v13 }
 0x92b   : > { %v1120_v15 = vadd.f32 1e-05, %v1119_v14 }
 0x92d   : > { %1663 = vrsqrt.f32 %v1120_v15 }
 0x93a   : > { %v1664_v16 = vpop.eup %1663 }
 0x93b   : > { %v1122_v18 = vmul.f32 %v1664_v16, %v1114_v9 }
 0x93d   : > { %v1129_v20 = vmul.f32 %v1435_v17, %v1122_v18 }
 0x93f   : > { %v1136_v21 = vadd.f32 %v1436_v19, %v1129_v20 }
 0x941   : > { %v1137_v22 = vpack.c.bf16 %v1136_v21, %v1136_v21 }
 0x943   : > { %1560 = vmatmul.mubr.msk.bf16.vlgmr.msra.gmra.mxu1 %vm1108_vm3, %v1137_v22 }
 0xa03   : > { %v1198_v28 = vpop.f32.mrf.mxu1 }
 0xa04   : > { %v1199_v29 = vadd.f32 %v1437_v27, %v1198_v28 }
 0xa05   : > { %v1561_v30 = vpop.f32.mrf.mxu1 }
 0xa06   : > { %v1205_v31 = vmul.f32 0.70710677, %v1199_v29  ;;  %v1204_v0 = vmul.f32 0.5, %v1199_v29 }
 0xa07   : > { %v1201_v32 = vpop.f32.mrf.mxu1 }
 0xa08   : > { %1665 = verf.f32 %v1205_v31 }
 0xa09   : > { %v1562_v4 = vpop.f32.mrf.mxu1 }
 0xa15   : > { %v1666_v33 = vpop.eup %1665 }
 0xa16   : > { %v1207_v34 = vadd.f32 1.0, %v1666_v33 }
 0xa18   : > { %v1208_v35 = vmul.f32 %v1207_v34, %v1204_v0 }
 0xa1a   : > { %v1209_v36 = vpack.c.bf16 %v1208_v35, %v1208_v35 }
 0xa1c   : > { %1572 = vmatmul.mubr.msk.bf16.vlgmr.msra.gmra.mxu0 %vm1249_vm4, %v1209_v36 }
 0xadc   : > { %v1287_v38 = vpop.f32.mrf.mxu0 }
 0xadd   : > { %v1288_v39 = vadd.f32 %v1441_v37, %v1287_v38 }
 0xade   : > { %v1573_v40 = vpop.f32.mrf.mxu0 }
 0xadf   : > { %v1293_v41 = vadd.f32 %v1288_v39, %v1105_v2 }
 0xae0   : > { %v1290_v42 = vpop.f32.mrf.mxu0 }
 0xae1   : > { %1294 = vst.msk [vmem:[%s433_s13] sm:$0xff] %vm1108_vm3, %v1293_v41 }
 0xae2   : > { %v1574_v43 = vpop.f32.mrf.mxu0 }
 0xae3   : > { %1680 = shalt.err (!%p1677_p5)
}
 0xae4   : > { %s1681_s13 = scalar_lea.hbm %s2036_s0, 128  ;;  %s1685_s16 = scalar_lea.hbm %s2094_s11, 256 }
 0xae5   : > { %p1682_p6 = scmp.ne.s32.totalorder %s2036_s0, %s1681_s13  ;;  %p1686_p10 = scmp.lt.s32.totalorder %s2036_s0, %s2094_s11 }
 0xae6   : > { %p1687_p11 = scmp.lt.s32.totalorder %s1685_s16, %s1681_s13 }
 0xae7   : > { %p1683_p7 = pnand %p1682_p6, %p1855_p4 }
 0xae8   : > { %p1688_p12 = por %p1687_p11, %p1686_p10 }
 0xae9   : > { %p1684_p9 = pneg %p1683_p7 }
 0xaeb   : > { %p1689_p13 = pnand %p1688_p12, %p1684_p9 }
 0xaed   : > { %1692 = shalt.err (!%p1689_p13)
}
 0xaee   : > { %1575 = dma.vmem_to_hbm [thread:$0]  (%p1855_p4), %s2038_s14, 128, %s2036_s0, %s1296_s20  }
 0xaef PF: > { %p1581_p0 = scmp.ge.s32.totalorder %s1743_s22, 2  ;;  %s1322_s23 = sand.u32 1, %s1723_s17  }
 0xaf0   : > { %s1323_s1 = scalar_lea.sflag [#allocation3], %s1322_s23 }
 0xaf1   : > { %p1578_p1 = pnand %p1581_p0, %p1862_p8 }
 0xaf3   : > { %p1579_p2 = pneg %p1578_p1 }
 0xaf5   : > { %1718 = dma.done.wait (%p1579_p2), %s1323_s1, 128  }
 0xaf6   : > { %1720 = vsyncadd (%p1579_p2), %s1323_s1, 4294967168  ;;  %s24_s22 = sadd.s32 1, %s1743_s22   ;;  %s2101_s17 = smov %s1727_s18 }
 0xaf7   : > { %p21_p3 = scmp.ge.s32.totalorder %s24_s22, 4   ;;  %s2102_s18 = smov %s1731_s19 }
 0xaf8   : > { %s2103_s19 = smov %s1868_s30  ;;  %s2104_s20 = smov %s1739_s21 }
 0xaf9   : > { %s2105_s21 = smov %s2107_s25  ;;  %23 = sbr.rel (!%p21_p3) target bundleno = 7 (0x7), region = 108 }
 0xafe   :  { %1328 = vsyncpa [#allocation3], 1 }
 0xaff   :  { %1330 = vsyncpa [#allocation3 + $0x1], 1 }

</bundles_post_ra>
